<compile_context>
chip_gen: v7x
topology: tpu7x:2x2x1
jax: 0.10.0
libtpu: 0.0.40
codegen_flags: <defaults>
</compile_context>

<pallas_src>
import jax
import jax.numpy as jnp
from jax.experimental import pallas as pl
from jax.experimental.pallas import tpu as pltpu

_IN = 28 * 28        # 784
_HIDDEN = 512
_OUT = 10
_OUT_PAD = 128       # lane-dense padded logits width
_NEG = -1e30         # pad-column bias: exp(_NEG - max) == 0.0 exactly in f32


def _mlp_kernel(x_ref, w1_ref, b1_ref, w2_ref, b2_ref, w3_ref, b3_ref, o_ref):
    # Layer 1: Linear(784 -> 512) + ReLU   (MXU matmul, f32 accumulate)
    h1 = jnp.dot(x_ref[...], w1_ref[...], preferred_element_type=jnp.float32)
    h1 = jnp.maximum(h1 + b1_ref[...], 0.0)

    # Layer 2: Linear(512 -> 512) + ReLU
    h2 = jnp.dot(h1, w2_ref[...], preferred_element_type=jnp.float32)
    h2 = jnp.maximum(h2 + b2_ref[...], 0.0)

    # Layer 3: Linear(512 -> 128 padded); pad cols have w=0, b=-1e30.
    logits = jnp.dot(h2, w3_ref[...], preferred_element_type=jnp.float32)
    logits = logits + b3_ref[...]

    # LogSoftmax over the padded 128 lanes (numerically stable). Pad columns
    # contribute exactly 0 to the sum, so columns [0, 10) equal
    # log_softmax(logits[:, :10], axis=1).
    m = jnp.max(logits, axis=1, keepdims=True)
    shifted = logits - m
    lse = jnp.log(jnp.sum(jnp.exp(shifted), axis=1, keepdims=True))
    o_ref[...] = shifted - lse


def _round_up(n, m):
    return (n + m - 1) // m * m


def feedforward_mnist_classifier(x, w1, b1, w2, b2, w3, b3):
    """x: (B, 1, 28, 28) float32  ->  (B, 10) float32 log-probabilities."""
    B = x.shape[0]
    x2d = x.reshape(B, _IN)  # nn.Flatten (row-major, same as torch)

    # Pad the final layer to a lane-dense 128-wide output.
    w3p = jnp.zeros((_HIDDEN, _OUT_PAD), jnp.float32).at[:, :_OUT].set(w3)
    b3p = jnp.full((1, _OUT_PAD), _NEG, jnp.float32).at[:, :_OUT].set(b3)

    # Batch tile: at most 256 rows per grid step; pad the batch with zero rows
    # (their outputs are discarded by the final slice).
    TB = min(256, _round_up(B, 8))
    B_pad = _round_up(B, TB)
    if B_pad != B:
        x2d = jnp.pad(x2d, ((0, B_pad - B), (0, 0)))

    # Weights/biases: full blocks, constant index maps -> resident in VMEM.
    weight_spec = lambda shape: pl.BlockSpec(shape, lambda i: (0, 0))

    out = pl.pallas_call(
        _mlp_kernel,
        out_shape=jax.ShapeDtypeStruct((B_pad, _OUT_PAD), jnp.float32),
        grid=(B_pad // TB,),
        in_specs=[
            pl.BlockSpec((TB, _IN), lambda i: (i, 0)),            # x tile
            weight_spec((_IN, _HIDDEN)), weight_spec((1, _HIDDEN)),
            weight_spec((_HIDDEN, _HIDDEN)), weight_spec((1, _HIDDEN)),
            weight_spec((_HIDDEN, _OUT_PAD)), weight_spec((1, _OUT_PAD)),
        ],
        out_specs=pl.BlockSpec((TB, _OUT_PAD), lambda i: (i, 0)),
        compiler_params=pltpu.CompilerParams(
            dimension_semantics=("parallel",),
        ),
    )(x2d, w1, b1, w2, b2, w3p, b3p)

    return out[:B, :_OUT]


def _init_params(key):
    """Deterministic synthetic parameters (uniform, torch-Linear-like scale)."""
    ks = jax.random.split(key, 6)

    def linear(kw, kb, fan_in, fan_out):
        bound = 1.0 / (fan_in ** 0.5)
        w = jax.random.uniform(kw, (fan_in, fan_out), jnp.float32, -bound, bound)
        b = jax.random.uniform(kb, (1, fan_out), jnp.float32, -bound, bound)
        return w, b

    w1, b1 = linear(ks[0], ks[1], _IN, _HIDDEN)
    w2, b2 = linear(ks[2], ks[3], _HIDDEN, _HIDDEN)
    w3, b3 = linear(ks[4], ks[5], _HIDDEN, _OUT)
    return w1, b1, w2, b2, w3, b3


def _reference(x, w1, b1, w2, b2, w3, b3):
    x2d = x.reshape(x.shape[0], -1)
    h1 = jnp.maximum(x2d @ w1 + b1, 0.0)
    h2 = jnp.maximum(h1 @ w2 + b2, 0.0)
    logits = h2 @ w3 + b3
    return jax.nn.log_softmax(logits, axis=1)


if __name__ == "__main__":
    key = jax.random.PRNGKey(0)
    k_x, k_p = jax.random.split(key)
    params = _init_params(k_p)

    # Small MNIST-shaped batch (exercises row padding: B=2 -> tile of 8).
    x = jax.random.normal(k_x, (2, 1, 28, 28), jnp.float32)
    out = feedforward_mnist_classifier(x, *params)
    out = jax.block_until_ready(out)
    ref = _reference(x, *params)
    assert out.shape == (2, 10)
    assert jnp.allclose(out, ref, atol=1e-5, rtol=1e-5)

    # Larger batch (exercises the multi-step batch grid: TB=256, 2 grid steps).
    x_big = jax.random.normal(k_x, (260, 1, 28, 28), jnp.float32)
    out_big = jax.block_until_ready(feedforward_mnist_classifier(x_big, *params))
    ref_big = _reference(x_big, *params)
    assert out_big.shape == (260, 10)
    assert jnp.allclose(out_big, ref_big, atol=1e-5, rtol=1e-5)

    print("KERNEL_OK")
</pallas_src>

<mosaic_0001>
module attributes {stable_mosaic.version = 11 : i64} {
  func.func @_mlp_kernel(%arg0: i32, %arg1: memref<8x784xf32, #tpu.memory_space<vmem>>, %arg2: memref<784x512xf32, #tpu.memory_space<vmem>>, %arg3: memref<1x512xf32, #tpu.memory_space<vmem>>, %arg4: memref<512x512xf32, #tpu.memory_space<vmem>>, %arg5: memref<1x512xf32, #tpu.memory_space<vmem>>, %arg6: memref<512x128xf32, #tpu.memory_space<vmem>>, %arg7: memref<1x128xf32, #tpu.memory_space<vmem>>, %arg8: memref<8x128xf32, #tpu.memory_space<vmem>>) attributes {dimension_semantics = [#tpu.dimension_semantics<parallel>], iteration_bounds = array<i64: 1>, scalar_prefetch = 0 : i64, scratch_operands = 0 : i64, tpu.core_type = #tpu.core_type<tc>, window_params = [{transform_indices = @transform_0, window_bounds = array<i64: 8, 784>}, {pipeline_mode = #tpu.pipeline_mode<synchronous>, transform_indices = @transform_1, window_bounds = array<i64: 784, 512>}, {pipeline_mode = #tpu.pipeline_mode<synchronous>, transform_indices = @transform_2, window_bounds = array<i64: 1, 512>}, {pipeline_mode = #tpu.pipeline_mode<synchronous>, transform_indices = @transform_3, window_bounds = array<i64: 512, 512>}, {pipeline_mode = #tpu.pipeline_mode<synchronous>, transform_indices = @transform_4, window_bounds = array<i64: 1, 512>}, {pipeline_mode = #tpu.pipeline_mode<synchronous>, transform_indices = @transform_5, window_bounds = array<i64: 512, 128>}, {pipeline_mode = #tpu.pipeline_mode<synchronous>, transform_indices = @transform_6, window_bounds = array<i64: 1, 128>}, {transform_indices = @transform_7, window_bounds = array<i64: 8, 128>}]} {
    %c0 = arith.constant 0 : index
    %c0_0 = arith.constant 0 : index
    %0 = vector.load %arg1[%c0, %c0_0] : memref<8x784xf32, #tpu.memory_space<vmem>>, vector<8x784xf32>
    %c0_1 = arith.constant 0 : index
    %c0_2 = arith.constant 0 : index
    %1 = vector.load %arg2[%c0_1, %c0_2] : memref<784x512xf32, #tpu.memory_space<vmem>>, vector<784x512xf32>
    %cst = arith.constant dense<0.000000e+00> : vector<8x512xf32>
    %2 = tpu.matmul %0, %1, %cst {dimension_numbers = #tpu.dot_dimension_numbers<[1], [0], [0], [1], [0, 0, 1, 1], [], []>} : vector<8x784xf32>, vector<784x512xf32>, vector<8x512xf32> -> vector<8x512xf32>
    %c0_3 = arith.constant 0 : index
    %c0_4 = arith.constant 0 : index
    %3 = vector.load %arg3[%c0_3, %c0_4] : memref<1x512xf32, #tpu.memory_space<vmem>>, vector<1x512xf32>
    %4 = vector.broadcast %3 : vector<1x512xf32> to vector<8x512xf32>
    %5 = arith.addf %2, %4 : vector<8x512xf32>
    %cst_5 = arith.constant 0.000000e+00 : f32
    %6 = vector.broadcast %cst_5 : f32 to vector<8x512xf32>
    %7 = arith.maximumf %5, %6 : vector<8x512xf32>
    %c0_6 = arith.constant 0 : index
    %c0_7 = arith.constant 0 : index
    %8 = vector.load %arg4[%c0_6, %c0_7] : memref<512x512xf32, #tpu.memory_space<vmem>>, vector<512x512xf32>
    %cst_8 = arith.constant dense<0.000000e+00> : vector<8x512xf32>
    %9 = tpu.matmul %7, %8, %cst_8 {dimension_numbers = #tpu.dot_dimension_numbers<[1], [0], [0], [1], [0, 0, 1, 1], [], []>} : vector<8x512xf32>, vector<512x512xf32>, vector<8x512xf32> -> vector<8x512xf32>
    %c0_9 = arith.constant 0 : index
    %c0_10 = arith.constant 0 : index
    %10 = vector.load %arg5[%c0_9, %c0_10] : memref<1x512xf32, #tpu.memory_space<vmem>>, vector<1x512xf32>
    %11 = vector.broadcast %10 : vector<1x512xf32> to vector<8x512xf32>
    %12 = arith.addf %9, %11 : vector<8x512xf32>
    %cst_11 = arith.constant 0.000000e+00 : f32
    %13 = vector.broadcast %cst_11 : f32 to vector<8x512xf32>
    %14 = arith.maximumf %12, %13 : vector<8x512xf32>
    %c0_12 = arith.constant 0 : index
    %c0_13 = arith.constant 0 : index
    %15 = vector.load %arg6[%c0_12, %c0_13] : memref<512x128xf32, #tpu.memory_space<vmem>>, vector<512x128xf32>
    %cst_14 = arith.constant dense<0.000000e+00> : vector<8x128xf32>
    %16 = tpu.matmul %14, %15, %cst_14 {dimension_numbers = #tpu.dot_dimension_numbers<[1], [0], [0], [1], [0, 0, 1, 1], [], []>} : vector<8x512xf32>, vector<512x128xf32>, vector<8x128xf32> -> vector<8x128xf32>
    %c0_15 = arith.constant 0 : index
    %c0_16 = arith.constant 0 : index
    %17 = vector.load %arg7[%c0_15, %c0_16] : memref<1x128xf32, #tpu.memory_space<vmem>>, vector<1x128xf32>
    %18 = vector.broadcast %17 : vector<1x128xf32> to vector<8x128xf32>
    %19 = arith.addf %16, %18 : vector<8x128xf32>
    %cst_17 = arith.constant dense<0xFF800000> : vector<8xf32>
    %20 = vector.multi_reduction <maximumf>, %19, %cst_17 [1] : vector<8x128xf32> to vector<8xf32>
    %21 = vector.shape_cast %20 : vector<8xf32> to vector<8x1xf32>
    %22 = vector.broadcast %21 : vector<8x1xf32> to vector<8x128xf32>
    %23 = arith.subf %19, %22 : vector<8x128xf32>
    %24 = math.exp %23 : vector<8x128xf32>
    %cst_18 = arith.constant dense<0.000000e+00> : vector<8xf32>
    %25 = vector.multi_reduction <add>, %24, %cst_18 [1] : vector<8x128xf32> to vector<8xf32>
    %26 = vector.shape_cast %25 : vector<8xf32> to vector<8x1xf32>
    %27 = math.log %26 : vector<8x1xf32>
    %28 = vector.broadcast %27 : vector<8x1xf32> to vector<8x128xf32>
    %29 = arith.subf %23, %28 : vector<8x128xf32>
    %c0_19 = arith.constant 0 : index
    %c0_20 = arith.constant 0 : index
    %30 = vector.load %arg8[%c0_19, %c0_20] : memref<8x128xf32, #tpu.memory_space<vmem>>, vector<8x128xf32>
    tpu.vector_store %arg8[%c0_19, %c0_20], %29 {strides = array<i32>} : memref<8x128xf32, #tpu.memory_space<vmem>>, vector<8x128xf32>,
    return
  }
  func.func @transform_0(%arg0: i32) -> (i32, i32) {
    %c0_i32 = arith.constant 0 : i32
    %c0_i32_0 = arith.constant 0 : i32
    return %arg0, %c0_i32 : i32, i32
  }
  func.func @transform_1(%arg0: i32) -> (i32, i32) {
    %c0_i32 = arith.constant 0 : i32
    %c0_i32_0 = arith.constant 0 : i32
    %c0_i32_1 = arith.constant 0 : i32
    return %c0_i32, %c0_i32_0 : i32, i32
  }
  func.func @transform_2(%arg0: i32) -> (i32, i32) {
    %c0_i32 = arith.constant 0 : i32
    %c0_i32_0 = arith.constant 0 : i32
    %c0_i32_1 = arith.constant 0 : i32
    return %c0_i32, %c0_i32_0 : i32, i32
  }
  func.func @transform_3(%arg0: i32) -> (i32, i32) {
    %c0_i32 = arith.constant 0 : i32
    %c0_i32_0 = arith.constant 0 : i32
    %c0_i32_1 = arith.constant 0 : i32
    return %c0_i32, %c0_i32_0 : i32, i32
  }
  func.func @transform_4(%arg0: i32) -> (i32, i32) {
    %c0_i32 = arith.constant 0 : i32
    %c0_i32_0 = arith.constant 0 : i32
    %c0_i32_1 = arith.constant 0 : i32
    return %c0_i32, %c0_i32_0 : i32, i32
  }
  func.func @transform_5(%arg0: i32) -> (i32, i32) {
    %c0_i32 = arith.constant 0 : i32
    %c0_i32_0 = arith.constant 0 : i32
    %c0_i32_1 = arith.constant 0 : i32
    return %c0_i32, %c0_i32_0 : i32, i32
  }
  func.func @transform_6(%arg0: i32) -> (i32, i32) {
    %c0_i32 = arith.constant 0 : i32
    %c0_i32_0 = arith.constant 0 : i32
    %c0_i32_1 = arith.constant 0 : i32
    return %c0_i32, %c0_i32_0 : i32, i32
  }
  func.func @transform_7(%arg0: i32) -> (i32, i32) {
    %c0_i32 = arith.constant 0 : i32
    %c0_i32_0 = arith.constant 0 : i32
    return %arg0, %c0_i32 : i32, i32
  }
}

</mosaic_0001>

<bundles_post_ra>
// kernel: tpu_custom_call.1
= control target key start
LH: loop header
LB: loop body
LE: loop exit
PB: predicated region body
PF: predicated region fallthrough
CT: control target
= control target key end

     0   :  { %12 = vsyncpa [#allocation3], 0  ;;  %s3109_s0 = inlined_call_operand.hbm [shape: f32[8,784], index: 0, kind: input, shape index: {}]   ;;  %s3110_s1 = inlined_call_operand.hbm [shape: f32[784,512], index: 1, kind: input, shape index: {}]   ;;  %s3111_s2 = inlined_call_operand.hbm [shape: f32[1,512], index: 2, kind: input, shape index: {}]   ;;  %s3112_s3 = inlined_call_operand.hbm [shape: f32[512,512], index: 3, kind: input, shape index: {}]   ;;  %s3113_s4 = inlined_call_operand.hbm [shape: f32[1,512], index: 4, kind: input, shape index: {}]   ;;  %s3114_s5 = inlined_call_operand.hbm [shape: f32[512,128], index: 5, kind: input, shape index: {}]   ;;  %s3115_s6 = inlined_call_operand.hbm [shape: f32[1,128], index: 6, kind: input, shape index: {}]   ;;  %s3116_s7 = inlined_call_operand.hbm [shape: f32[8,128], index: 7, kind: output, shape index: {}]  }
   0x1   :  { %13 = vsyncpa [#allocation6], 0 }
   0x2   :  { %14 = vsyncpa [#allocation9], 0 }
   0x3   :  { %15 = vsyncpa [#allocation12], 0 }
   0x4   :  { %16 = vsyncpa [#allocation4], 0  ;;  %s2929_s24 = smov [#allocation5]   ;;  %s2743_s28 = scalar_lea.hbm %s3110_s1, 50176 }
   0x5   :  { %s32_s25 = sshll.u32 %s2929_s24, 4  ;;  %p2744_p0 = scmp.ne.s32.totalorder %s3110_s1, %s2743_s28  ;;  %s33_s25 = int_to_ptr.vmem [resolvable:$true] %s32_s25 }
   0x6   :  { %p2747_p1 = scmp.lt.u32.totalorder %s2743_s28, %s3110_s1 }
   0x8   :  { %p2749_p2 = pnand %p2747_p1, %p2744_p0 }
   0xa   :  { %2752 = shalt.err (!%p2749_p2)
}
   0xb   :  { %s2753_s10 = scalar_lea.vmem %s33_s25, 50176  ;;  %p2758_p4 = scmp.lt.s32.totalorder %s33_s25, %s33_s25 }
   0xc   :  { %p2754_p3 = scmp.ne.s32.totalorder %s33_s25, %s2753_s10  ;;  %p2759_p5 = scmp.lt.s32.totalorder %s2753_s10, %s2753_s10 }
   0xe   :  { %p2760_p6 = por %p2759_p5, %p2758_p4 }
  0x10   :  { %p2761_p7 = pnand %p2760_p6, %p2754_p3 }
  0x12   :  { %2764 = shalt.err (!%p2761_p7)
}
  0x13   :  { %s2930_s11 = smov 512   ;;  %s2931_s12 = smov 32  }
  0x14   :  { %38 = dma.hbm_to_vmem [thread:$0]  %s3110_s1, 50176, %s33_s25, [#allocation6], %s2930_s11, %s2930_s11, %s2931_s12  }
  0x15   :  { %s2932_s15 = smov [#allocation8]   ;;  %s2933_s17 = smov [#allocation11]  }
  0x16   :  { %s54_s16 = sshll.u32 %s2932_s15, 4  ;;  %s76_s18 = sshll.u32 %s2933_s17, 4  ;;  %s55_s16 = int_to_ptr.vmem [resolvable:$true] %s54_s16  ;;  %s77_s18 = int_to_ptr.vmem [resolvable:$true] %s76_s18 }
  0x17   :  { %s2765_s21 = scalar_lea.hbm %s3112_s3, 32768 }
  0x18   :  { %p2766_p8 = scmp.ne.s32.totalorder %s3112_s3, %s2765_s21  ;;  %p2769_p9 = scmp.lt.u32.totalorder %s2765_s21, %s3112_s3 }
  0x1a   :  { %p2771_p10 = pnand %p2769_p9, %p2766_p8 }
  0x1c   :  { %2774 = shalt.err (!%p2771_p10)
}
  0x1d   :  { %s2775_s1 = scalar_lea.vmem %s55_s16, 32768  ;;  %p2780_p12 = scmp.lt.s32.totalorder %s55_s16, %s55_s16 }
  0x1e   :  { %p2776_p11 = scmp.ne.s32.totalorder %s55_s16, %s2775_s1  ;;  %p2781_p13 = scmp.lt.s32.totalorder %s2775_s1, %s2775_s1 }
  0x20   :  { %p2782_p0 = por %p2781_p13, %p2780_p12 }
  0x22   :  { %p2783_p1 = pnand %p2782_p0, %p2776_p11 }
  0x24   :  { %2786 = shalt.err (!%p2783_p1)
}
  0x25   :  { %60 = dma.hbm_to_vmem [thread:$0]  %s3112_s3, 32768, %s55_s16, [#allocation9], %s2930_s11, %s2930_s11, %s2931_s12  }
  0x26   :  { %s2787_s30 = scalar_lea.hbm %s3114_s5, 8192 }
  0x27   :  { %p2788_p2 = scmp.ne.s32.totalorder %s3114_s5, %s2787_s30  ;;  %p2791_p3 = scmp.lt.u32.totalorder %s2787_s30, %s3114_s5 }
  0x29   :  { %p2793_p4 = pnand %p2791_p3, %p2788_p2 }
  0x2b   :  { %2796 = shalt.err (!%p2793_p4)
}
  0x2c   :  { %s2797_s14 = scalar_lea.vmem %s77_s18, 8192  ;;  %p2802_p6 = scmp.lt.s32.totalorder %s77_s18, %s77_s18 }
  0x2d   :  { %p2798_p5 = scmp.ne.s32.totalorder %s77_s18, %s2797_s14  ;;  %p2803_p7 = scmp.lt.s32.totalorder %s2797_s14, %s2797_s14 }
  0x2f   :  { %p2804_p8 = por %p2803_p7, %p2802_p6 }
  0x31   :  { %p2805_p9 = pnand %p2804_p8, %p2798_p5 }
  0x33   :  { %2808 = shalt.err (!%p2805_p9)
}
  0x34   :  { %s2934_s3 = smov 128   ;;  %s2935_s11 = smov 8  }
  0x35   :  { %82 = dma.hbm_to_vmem [thread:$0]  %s3114_s5, 8192, %s77_s18, [#allocation12], %s2934_s3, %s2934_s3, %s2935_s11  }
  0x36   :  { %s2936_s16 = smov [#allocation2]   ;;  %s2937_s19 = smov [#allocation7]  }
  0x37   :  { %s23_s17 = sshll.u32 %s2936_s16, 4  ;;  %s45_s20 = sshll.u32 %s2937_s19, 4  ;;  %s24_s17 = int_to_ptr.vmem [resolvable:$true] %s23_s17  ;;  %s46_s20 = int_to_ptr.vmem [resolvable:$true] %s45_s20 }
  0x38   :  { %s2809_s23 = scalar_lea.hbm %s3109_s0, 896 }
  0x39   :  { %p2810_p10 = scmp.ne.s32.totalorder %s3109_s0, %s2809_s23  ;;  %p2813_p11 = scmp.lt.u32.totalorder %s2809_s23, %s3109_s0 }
  0x3b   :  { %p2815_p12 = pnand %p2813_p11, %p2810_p10 }
  0x3d   :  { %2818 = shalt.err (!%p2815_p12)
}
  0x3e   :  { %s2819_s5 = scalar_lea.vmem %s24_s17, 896  ;;  %p2824_p0 = scmp.lt.s32.totalorder %s24_s17, %s24_s17 }
  0x3f   :  { %p2820_p13 = scmp.ne.s32.totalorder %s24_s17, %s2819_s5  ;;  %p2825_p1 = scmp.lt.s32.totalorder %s2819_s5, %s2819_s5 }
  0x41   :  { %p2826_p2 = por %p2825_p1, %p2824_p0 }
  0x43   :  { %p2827_p3 = pnand %p2826_p2, %p2820_p13 }
  0x45   :  { %2830 = shalt.err (!%p2827_p3)
}
  0x46   :  { %26 = dma.hbm_to_vmem [thread:$0]  %s3109_s0, 896, %s24_s17, [#allocation3]  }
  0x47   :  { %s2831_s30 = scalar_lea.hbm %s3111_s2, 64 }
  0x48   :  { %p2832_p4 = scmp.ne.s32.totalorder %s3111_s2, %s2831_s30  ;;  %p2835_p5 = scmp.lt.u32.totalorder %s2831_s30, %s3111_s2 }
  0x4a   :  { %p2837_p6 = pnand %p2835_p5, %p2832_p4 }
  0x4c   :  { %2840 = shalt.err (!%p2837_p6)
}
  0x4d   :  { %s2841_s14 = scalar_lea.vmem %s46_s20, 64  ;;  %p2846_p8 = scmp.lt.s32.totalorder %s46_s20, %s46_s20 }
  0x4e   :  { %p2842_p7 = scmp.ne.s32.totalorder %s46_s20, %s2841_s14  ;;  %p2847_p9 = scmp.lt.s32.totalorder %s2841_s14, %s2841_s14 }
  0x50   :  { %p2848_p10 = por %p2847_p9, %p2846_p8 }
  0x52   :  { %p2849_p11 = pnand %p2848_p10, %p2842_p7 }
  0x54   :  { %2852 = shalt.err (!%p2849_p11)
}
  0x55   :  { %48 = dma.hbm_to_vmem [thread:$0]  %s3111_s2, 64, %s46_s20, [#allocation6]  }
  0x56   :  { %s2938_s11 = smov [#allocation10]   ;;  %s2939_s15 = smov [#allocation13]  }
  0x57   :  { %s67_s12 = sshll.u32 %s2938_s11, 4  ;;  %s89_s16 = sshll.u32 %s2939_s15, 4  ;;  %s68_s12 = int_to_ptr.vmem [resolvable:$true] %s67_s12  ;;  %s90_s16 = int_to_ptr.vmem [resolvable:$true] %s89_s16 }
  0x58   :  { %s2853_s21 = scalar_lea.hbm %s3113_s4, 64 }
  0x59   :  { %p2854_p12 = scmp.ne.s32.totalorder %s3113_s4, %s2853_s21  ;;  %p2857_p13 = scmp.lt.u32.totalorder %s2853_s21, %s3113_s4 }
  0x5b   :  { %p2859_p0 = pnand %p2857_p13, %p2854_p12 }
  0x5d   :  { %2862 = shalt.err (!%p2859_p0)
}
  0x5e   :  { %s2863_s2 = scalar_lea.vmem %s68_s12, 64  ;;  %p2868_p2 = scmp.lt.s32.totalorder %s68_s12, %s68_s12 }
  0x5f   :  { %p2864_p1 = scmp.ne.s32.totalorder %s68_s12, %s2863_s2  ;;  %p2869_p3 = scmp.lt.s32.totalorder %s2863_s2, %s2863_s2 }
  0x61   :  { %p2870_p4 = por %p2869_p3, %p2868_p2 }
  0x63   :  { %p2871_p5 = pnand %p2870_p4, %p2864_p1 }
  0x65   :  { %2874 = shalt.err (!%p2871_p5)
}
  0x66   :  { %70 = dma.hbm_to_vmem [thread:$0]  %s3113_s4, 64, %s68_s12, [#allocation9]  }
  0x67   :  { %s2875_s18 = scalar_lea.hbm %s3115_s6, 16 }
  0x68   :  { %p2876_p6 = scmp.ne.s32.totalorder %s3115_s6, %s2875_s18  ;;  %p2879_p7 = scmp.lt.u32.totalorder %s2875_s18, %s3115_s6 }
  0x6a   :  { %p2881_p8 = pnand %p2879_p7, %p2876_p6 }
  0x6c   :  { %2884 = shalt.err (!%p2881_p8)
}
  0x6d   :  { %s2885_s8 = scalar_lea.vmem %s90_s16, 16  ;;  %s2889_s9 = scalar_lea.vmem %s90_s16, 32 }
  0x6e   :  { %p2886_p9 = scmp.ne.s32.totalorder %s90_s16, %s2885_s8  ;;  %p2890_p10 = scmp.lt.s32.totalorder %s90_s16, %s90_s16 }
  0x6f   :  { %p2891_p11 = scmp.lt.s32.totalorder %s2889_s9, %s2885_s8 }
  0x71   :  { %p2892_p12 = por %p2891_p11, %p2890_p10 }
  0x73   :  { %p2893_p13 = pnand %p2892_p12, %p2886_p9 }
  0x75   :  { %2896 = shalt.err (!%p2893_p13)
}
  0x76   :  { %92 = dma.hbm_to_vmem [thread:$0]  %s3115_s6, 16, %s90_s16, [#allocation12]  }
  0x77   :  { %2919 = dma.done.wait [#allocation3], 896  }
  0x78   :  { %2920 = vsyncadd [#allocation3], 4294966400 }
  0x79   :  { %2921 = dma.done.wait [#allocation6], 50240  }
  0x7a   :  { %2922 = vsyncadd [#allocation6], 4294917056 }
  0x7b   :  { %2923 = dma.done.wait [#allocation9], 32832  }
  0x7c   :  { %2924 = vsyncadd [#allocation9], 4294934464 }
  0x7d   :  { %2925 = dma.done.wait [#allocation12], 8208  }
  0x7e   :  { %2926 = vsyncadd [#allocation12], 4294959088  ;;  %v122_v0 = vld [vmem:[#allocation5 + $0x8] sm:$0xff]  ;;  %v124_v2 = vld [vmem:[#allocation5 + $0x18] sm:$0xff]  ;;  %vm535_vm0 = vcmask 130048   ;;  %s2941_s6 = smov [#allocation14]  }
  0x7f   :  { %v126_v1 = vld [vmem:[#allocation5 + $0x28] sm:$0xff]  ;;  %v128_v4 = vld [vmem:[#allocation5 + $0x38] sm:$0xff]  ;;  %v121_v5 = vld [vmem:[#allocation5] sm:$0xff]  ;;  %s1905_s13 = sshll.u32 %s2941_s6, 4  ;;  %s1906_s13 = int_to_ptr.vmem [resolvable:$true] %s1905_s13 }
  0x80   :  { %v1990_v3 = vpack.c.bf16 %v126_v1, %v122_v0  ;;  %v125_v6 = vld [vmem:[#allocation5 + $0x20] sm:$0xff]  ;;  %v2186_v7 = vpack.c.bf16 %v128_v4, %v124_v2  ;;  %v123_v9 = vld [vmem:[#allocation5 + $0x10] sm:$0xff]  ;;  %v130_v11 = vld [vmem:[#allocation5 + $0x48] sm:$0xff]  ;;  %s2897_s14 = scalar_lea.vmem %s1906_s13, 128  ;;  %p2902_p1 = scmp.lt.s32.totalorder %s1906_s13, %s1906_s13 }
  0x81   :  { %v1992_v8 = vpack.c.bf16 %v125_v6, %v121_v5  ;;  %v127_v10 = vld [vmem:[#allocation5 + $0x30] sm:$0xff]  ;;  %v134_v13 = vld [vmem:[#allocation5 + $0x68] sm:$0xff]  ;;  %v132_v14 = vld [vmem:[#allocation5 + $0x58] sm:$0xff]  ;;  %p2898_p0 = scmp.ne.s32.totalorder %s1906_s13, %s2897_s14  ;;  %p2903_p2 = scmp.lt.s32.totalorder %s2897_s14, %s2897_s14 }
  0x82   :  { %1991 = vmatprep.subr.bf16.mxu0 %v1990_v3  ;;  %v2188_v12 = vpack.c.bf16 %v127_v10, %v123_v9  ;;  %v136_v15 = vld [vmem:[#allocation5 + $0x78] sm:$0xff]  ;;  %2187 = vmatprep.subr.bf16.mxu1 %v2186_v7  ;;  %v1994_v16 = vpack.c.bf16 %v134_v13, %v130_v11  ;;  %v129_v18 = vld [vmem:[#allocation5 + $0x40] sm:$0xff]  ;;  %v131_v20 = vld [vmem:[#allocation5 + $0x50] sm:$0xff] }
  0x83   :  { %1993 = vmatpush1.bf16.msra.mxu0 %v1992_v8  ;;  %v2190_v17 = vpack.c.bf16 %v136_v15, %v132_v14  ;;  %v133_v19 = vld [vmem:[#allocation5 + $0x60] sm:$0xff]  ;;  %v135_v22 = vld [vmem:[#allocation5 + $0x70] sm:$0xff]  ;;  %v138_v23 = vld [vmem:[#allocation5 + $0x88] sm:$0xff]  ;;  %p2904_p3 = por %p2903_p2, %p2902_p1 }
  0x84   :  { %2189 = vmatpush1.bf16.msra.mxu1 %v2188_v12  ;;  %v1996_v21 = vpack.c.bf16 %v133_v19, %v129_v18  ;;  %v142_v24 = vld [vmem:[#allocation5 + $0xa8] sm:$0xff]  ;;  %1995 = vmatprep.subr.bf16.mxu0 %v1994_v16  ;;  %v2192_v25 = vpack.c.bf16 %v135_v22, %v131_v20  ;;  %v140_v27 = vld [vmem:[#allocation5 + $0x98] sm:$0xff]  ;;  %v137_v29 = vld [vmem:[#allocation5 + $0x80] sm:$0xff] }
  0x85   :  { %2191 = vmatprep.subr.bf16.mxu1 %v2190_v17  ;;  %v1998_v26 = vpack.c.bf16 %v142_v24, %v138_v23  ;;  %v144_v28 = vld [vmem:[#allocation5 + $0xb8] sm:$0xff]  ;;  %v141_v31 = vld [vmem:[#allocation5 + $0xa0] sm:$0xff]  ;;  %v139_v32 = vld [vmem:[#allocation5 + $0x90] sm:$0xff]  ;;  %p2905_p4 = pnand %p2904_p3, %p2898_p0 }
  0x86   :  { %v2194_v30 = vpack.c.bf16 %v144_v28, %v140_v27  ;;  %v143_v33 = vld [vmem:[#allocation5 + $0xb0] sm:$0xff]  ;;  %v2000_v34 = vpack.c.bf16 %v141_v31, %v137_v29  ;;  %v146_v35 = vld [vmem:[#allocation5 + $0xc8] sm:$0xff]  ;;  %v148_v37 = vld [vmem:[#allocation5 + $0xd8] sm:$0xff] }
  0x87   :  { %1997 = vmatpush1.bf16.msra.mxu0 %v1996_v21  ;;  %v150_v36 = vld [vmem:[#allocation5 + $0xe8] sm:$0xff]  ;;  %v2196_v38 = vpack.c.bf16 %v143_v33, %v139_v32  ;;  %v152_v40 = vld [vmem:[#allocation5 + $0xf8] sm:$0xff]  ;;  %v145_v41 = vld [vmem:[#allocation5 + $0xc0] sm:$0xff] }
  0x88   :  { %2193 = vmatpush1.bf16.msra.mxu1 %v2192_v25  ;;  %1999 = vmatprep.subr.bf16.mxu0 %v1998_v26  ;;  %v2002_v39 = vpack.c.bf16 %v150_v36, %v146_v35  ;;  %v149_v42 = vld [vmem:[#allocation5 + $0xe0] sm:$0xff]  ;;  %v2198_v43 = vpack.c.bf16 %v152_v40, %v148_v37  ;;  %v147_v44 = vld [vmem:[#allocation5 + $0xd0] sm:$0xff]  ;;  %v154_v46 = vld [vmem:[#allocation5 + $0x108] sm:$0xff] }
  0x89   :  { %2195 = vmatprep.subr.bf16.mxu1 %v2194_v30  ;;  %v151_v45 = vld [vmem:[#allocation5 + $0xf0] sm:$0xff]  ;;  %v158_v47 = vld [vmem:[#allocation5 + $0x128] sm:$0xff]  ;;  %v156_v48 = vld [vmem:[#allocation5 + $0x118] sm:$0xff]  ;;  %v2004_v50 = vpack.c.bf16 %v149_v42, %v145_v41 }
  0x8a   :  { %v160_v49 = vld [vmem:[#allocation5 + $0x138] sm:$0xff]  ;;  %v2200_v51 = vpack.c.bf16 %v151_v45, %v147_v44  ;;  %v2006_v52 = vpack.c.bf16 %v158_v47, %v154_v46  ;;  %v153_v53 = vld [vmem:[#allocation5 + $0x100] sm:$0xff]  ;;  %v155_v55 = vld [vmem:[#allocation5 + $0x110] sm:$0xff] }
  0x8b   :  { %2001 = vmatpush1.bf16.msra.mxu0 %v2000_v34  ;;  %v157_v54 = vld [vmem:[#allocation5 + $0x120] sm:$0xff]  ;;  %v2202_v56 = vpack.c.bf16 %v160_v49, %v156_v48  ;;  %v159_v57 = vld [vmem:[#allocation5 + $0x130] sm:$0xff]  ;;  %v162_v58 = vld [vmem:[#allocation5 + $0x148] sm:$0xff] }
  0x8c   :  { %2197 = vmatpush1.bf16.msra.mxu1 %v2196_v38  ;;  %2003 = vmatprep.subr.bf16.mxu0 %v2002_v39  ;;  %v166_v59 = vld [vmem:[#allocation5 + $0x168] sm:$0xff]  ;;  %v164_v60 = vld [vmem:[#allocation5 + $0x158] sm:$0xff]  ;;  %v2008_v62 = vpack.c.bf16 %v157_v54, %v153_v53  ;;  %v2204_v63 = vpack.c.bf16 %v159_v57, %v155_v55  ;;  %v161_v1 = vld [vmem:[#allocation5 + $0x140] sm:$0xff] }
  0x8d   :  { %2199 = vmatprep.subr.bf16.mxu1 %v2198_v43  ;;  %v168_v61 = vld [vmem:[#allocation5 + $0x178] sm:$0xff]  ;;  %v2010_v0 = vpack.c.bf16 %v166_v59, %v162_v58  ;;  %v165_v2 = vld [vmem:[#allocation5 + $0x160] sm:$0xff]  ;;  %v163_v3 = vld [vmem:[#allocation5 + $0x150] sm:$0xff] }
  0x8e   :  { %v2206_v4 = vpack.c.bf16 %v168_v61, %v164_v60  ;;  %v167_v5 = vld [vmem:[#allocation5 + $0x170] sm:$0xff]  ;;  %v170_v6 = vld [vmem:[#allocation5 + $0x188] sm:$0xff]  ;;  %v172_v8 = vld [vmem:[#allocation5 + $0x198] sm:$0xff]  ;;  %v2012_v10 = vpack.c.bf16 %v165_v2, %v161_v1 }
  0x8f   :  { %2005 = vmatpush1.bf16.msra.mxu0 %v2004_v50  ;;  %v174_v7 = vld [vmem:[#allocation5 + $0x1a8] sm:$0xff]  ;;  %v176_v9 = vld [vmem:[#allocation5 + $0x1b8] sm:$0xff]  ;;  %v2208_v11 = vpack.c.bf16 %v167_v5, %v163_v3  ;;  %v169_v13 = vld [vmem:[#allocation5 + $0x180] sm:$0xff] }
  0x90   :  { %2201 = vmatpush1.bf16.msra.mxu1 %v2200_v51  ;;  %2007 = vmatprep.subr.bf16.mxu0 %v2006_v52  ;;  %v2014_v12 = vpack.c.bf16 %v174_v7, %v170_v6  ;;  %v173_v14 = vld [vmem:[#allocation5 + $0x1a0] sm:$0xff]  ;;  %v171_v15 = vld [vmem:[#allocation5 + $0x190] sm:$0xff]  ;;  %v2210_v16 = vpack.c.bf16 %v176_v9, %v172_v8  ;;  %v178_v18 = vld [vmem:[#allocation5 + $0x1c8] sm:$0xff] }
  0x91   :  { %2203 = vmatprep.subr.bf16.mxu1 %v2202_v56  ;;  %v175_v17 = vld [vmem:[#allocation5 + $0x1b0] sm:$0xff]  ;;  %v182_v19 = vld [vmem:[#allocation5 + $0x1e8] sm:$0xff]  ;;  %v180_v20 = vld [vmem:[#allocation5 + $0x1d8] sm:$0xff]  ;;  %v2016_v22 = vpack.c.bf16 %v173_v14, %v169_v13 }
  0x92   :  { %v184_v21 = vld [vmem:[#allocation5 + $0x1f8] sm:$0xff]  ;;  %v2212_v23 = vpack.c.bf16 %v175_v17, %v171_v15  ;;  %v2018_v24 = vpack.c.bf16 %v182_v19, %v178_v18  ;;  %v177_v25 = vld [vmem:[#allocation5 + $0x1c0] sm:$0xff]  ;;  %v179_v27 = vld [vmem:[#allocation5 + $0x1d0] sm:$0xff] }
  0x93   :  { %2009 = vmatpush1.bf16.msra.mxu0 %v2008_v62  ;;  %v181_v26 = vld [vmem:[#allocation5 + $0x1e0] sm:$0xff]  ;;  %v2214_v28 = vpack.c.bf16 %v184_v21, %v180_v20  ;;  %v183_v29 = vld [vmem:[#allocation5 + $0x1f0] sm:$0xff]  ;;  %v186_v30 = vld [vmem:[#allocation5 + $0x208] sm:$0xff] }
  0x94   :  { %2205 = vmatpush1.bf16.msra.mxu1 %v2204_v63  ;;  %2011 = vmatprep.subr.bf16.mxu0 %v2010_v0  ;;  %v190_v31 = vld [vmem:[#allocation5 + $0x228] sm:$0xff]  ;;  %v188_v32 = vld [vmem:[#allocation5 + $0x218] sm:$0xff]  ;;  %v2020_v34 = vpack.c.bf16 %v181_v26, %v177_v25  ;;  %v2216_v35 = vpack.c.bf16 %v183_v29, %v179_v27  ;;  %v185_v37 = vld [vmem:[#allocation5 + $0x200] sm:$0xff] }
  0x95   :  { %2207 = vmatprep.subr.bf16.mxu1 %v2206_v4  ;;  %v192_v33 = vld [vmem:[#allocation5 + $0x238] sm:$0xff]  ;;  %v2022_v36 = vpack.c.bf16 %v190_v31, %v186_v30  ;;  %v189_v38 = vld [vmem:[#allocation5 + $0x220] sm:$0xff]  ;;  %v187_v39 = vld [vmem:[#allocation5 + $0x210] sm:$0xff] }
  0x96   :  { %v2218_v40 = vpack.c.bf16 %v192_v33, %v188_v32  ;;  %v191_v41 = vld [vmem:[#allocation5 + $0x230] sm:$0xff]  ;;  %v194_v42 = vld [vmem:[#allocation5 + $0x248] sm:$0xff]  ;;  %v196_v44 = vld [vmem:[#allocation5 + $0x258] sm:$0xff]  ;;  %v2024_v46 = vpack.c.bf16 %v189_v38, %v185_v37 }
  0x97   :  { %2013 = vmatpush1.bf16.msra.mxu0 %v2012_v10  ;;  %v198_v43 = vld [vmem:[#allocation5 + $0x268] sm:$0xff]  ;;  %v200_v45 = vld [vmem:[#allocation5 + $0x278] sm:$0xff]  ;;  %v2220_v47 = vpack.c.bf16 %v191_v41, %v187_v39  ;;  %v193_v49 = vld [vmem:[#allocation5 + $0x240] sm:$0xff] }
  0x98   :  { %2209 = vmatpush1.bf16.msra.mxu1 %v2208_v11  ;;  %2015 = vmatprep.subr.bf16.mxu0 %v2014_v12  ;;  %v2026_v48 = vpack.c.bf16 %v198_v43, %v194_v42  ;;  %v197_v50 = vld [vmem:[#allocation5 + $0x260] sm:$0xff]  ;;  %v195_v51 = vld [vmem:[#allocation5 + $0x250] sm:$0xff]  ;;  %v2222_v52 = vpack.c.bf16 %v200_v45, %v196_v44  ;;  %v202_v54 = vld [vmem:[#allocation5 + $0x288] sm:$0xff] }
  0x99   :  { %2211 = vmatprep.subr.bf16.mxu1 %v2210_v16  ;;  %v199_v53 = vld [vmem:[#allocation5 + $0x270] sm:$0xff]  ;;  %v206_v55 = vld [vmem:[#allocation5 + $0x2a8] sm:$0xff]  ;;  %v204_v56 = vld [vmem:[#allocation5 + $0x298] sm:$0xff]  ;;  %v2028_v58 = vpack.c.bf16 %v197_v50, %v193_v49 }
  0x9a   :  { %v208_v57 = vld [vmem:[#allocation5 + $0x2b8] sm:$0xff]  ;;  %v2224_v59 = vpack.c.bf16 %v199_v53, %v195_v51  ;;  %v2030_v60 = vpack.c.bf16 %v206_v55, %v202_v54  ;;  %v201_v61 = vld [vmem:[#allocation5 + $0x280] sm:$0xff]  ;;  %v203_v63 = vld [vmem:[#allocation5 + $0x290] sm:$0xff] }
  0x9b   :  { %2017 = vmatpush1.bf16.msra.mxu0 %v2016_v22  ;;  %v205_v62 = vld [vmem:[#allocation5 + $0x2a0] sm:$0xff]  ;;  %v2226_v0 = vpack.c.bf16 %v208_v57, %v204_v56  ;;  %v207_v1 = vld [vmem:[#allocation5 + $0x2b0] sm:$0xff]  ;;  %v210_v2 = vld [vmem:[#allocation5 + $0x2c8] sm:$0xff] }
  0x9c   :  { %2213 = vmatpush1.bf16.msra.mxu1 %v2212_v23  ;;  %2019 = vmatprep.subr.bf16.mxu0 %v2018_v24  ;;  %v214_v3 = vld [vmem:[#allocation5 + $0x2e8] sm:$0xff]  ;;  %v212_v4 = vld [vmem:[#allocation5 + $0x2d8] sm:$0xff]  ;;  %v2032_v6 = vpack.c.bf16 %v205_v62, %v201_v61  ;;  %v209_v7 = vld [vmem:[#allocation5 + $0x2c0] sm:$0xff]  ;;  %v2228_v8 = vpack.c.bf16 %v207_v1, %v203_v63 }
  0x9d   :  { %2215 = vmatprep.subr.bf16.mxu1 %v2214_v28  ;;  %v216_v5 = vld [vmem:[#allocation5 + $0x2f8] sm:$0xff]  ;;  %v2034_v9 = vpack.c.bf16 %v214_v3, %v210_v2  ;;  %v213_v10 = vld [vmem:[#allocation5 + $0x2e0] sm:$0xff]  ;;  %v211_v11 = vld [vmem:[#allocation5 + $0x2d0] sm:$0xff] }
  0x9e   :  { %v215_v12 = vld [vmem:[#allocation5 + $0x2f0] sm:$0xff]  ;;  %v2230_v13 = vpack.c.bf16 %v216_v5, %v212_v4  ;;  %v218_v14 = vld [vmem:[#allocation5 + $0x308] sm:$0xff]  ;;  %v220_v17 = vld [vmem:[#allocation5 + $0x318] sm:$0xff]  ;;  %v2036_v19 = vpack.c.bf16 %v213_v10, %v209_v7 }
  0x9f   :  { %2021 = vmatpush1.bf16.msra.mxu0 %v2020_v34  ;;  %v222_v15 = vld [vmem:[#allocation5 + $0x328] sm:$0xff]  ;;  %v115_v16 = vld [vmem:[#allocation2 + $0x8] sm:$0xff]  ;;  %v224_v18 = vld [vmem:[#allocation5 + $0x338] sm:$0xff]  ;;  %v2232_v20 = vpack.c.bf16 %v215_v12, %v211_v11 }
  0xa0   :  { %2217 = vmatpush1.bf16.msra.mxu1 %v2216_v35  ;;  %2023 = vmatprep.subr.bf16.mxu0 %v2022_v36  ;;  %v2038_v21 = vpack.c.bf16 %v222_v15, %v218_v14  ;;  %v217_v22 = vld [vmem:[#allocation5 + $0x300] sm:$0xff]  ;;  %v219_v24 = vld [vmem:[#allocation5 + $0x310] sm:$0xff]  ;;  %v2234_v25 = vpack.c.bf16 %v224_v18, %v220_v17  ;;  %v226_v27 = vld [vmem:[#allocation5 + $0x348] sm:$0xff] }
  0xa1   :  { %2219 = vmatprep.subr.bf16.mxu1 %v2218_v40  ;;  %603 = vmatprep.mubr.f32.mxu0 %v115_v16  ;;  %v221_v23 = vld [vmem:[#allocation5 + $0x320] sm:$0xff]  ;;  %v223_v26 = vld [vmem:[#allocation5 + $0x330] sm:$0xff]  ;;  %v230_v28 = vld [vmem:[#allocation5 + $0x368] sm:$0xff] }
  0xa2   :  { %887 = vmatprep.mubr.f32.mxu1 %v115_v16  ;;  %v228_v29 = vld [vmem:[#allocation5 + $0x358] sm:$0xff]  ;;  %v2040_v31 = vpack.c.bf16 %v221_v23, %v217_v22  ;;  %v2236_v32 = vpack.c.bf16 %v223_v26, %v219_v24  ;;  %v2042_v33 = vpack.c.bf16 %v230_v28, %v226_v27  ;;  %v225_v34 = vld [vmem:[#allocation5 + $0x340] sm:$0xff]  ;;  %v227_v36 = vld [vmem:[#allocation5 + $0x350] sm:$0xff] }
  0xa3   :  { %2025 = vmatpush1.bf16.msra.mxu0 %v2024_v46  ;;  %v232_v30 = vld [vmem:[#allocation5 + $0x378] sm:$0xff]  ;;  %v229_v35 = vld [vmem:[#allocation5 + $0x360] sm:$0xff]  ;;  %v231_v38 = vld [vmem:[#allocation5 + $0x370] sm:$0xff] }
  0xa4   :  { %2221 = vmatpush1.bf16.msra.mxu1 %v2220_v47  ;;  %2027 = vmatprep.subr.bf16.mxu0 %v2026_v48  ;;  %v2238_v37 = vpack.c.bf16 %v232_v30, %v228_v29  ;;  %v234_v39 = vld [vmem:[#allocation5 + $0x388] sm:$0xff]  ;;  %v236_v41 = vld [vmem:[#allocation5 + $0x398] sm:$0xff]  ;;  %v2044_v43 = vpack.c.bf16 %v229_v35, %v225_v34  ;;  %v2240_v44 = vpack.c.bf16 %v231_v38, %v227_v36  ;;  %v233_v46 = vld [vmem:[#allocation5 + $0x380] sm:$0xff] }
  0xa5   :  { %2223 = vmatprep.subr.bf16.mxu1 %v2222_v52  ;;  %v238_v40 = vld [vmem:[#allocation5 + $0x3a8] sm:$0xff]  ;;  %v240_v42 = vld [vmem:[#allocation5 + $0x3b8] sm:$0xff]  ;;  %v237_v47 = vld [vmem:[#allocation5 + $0x3a0] sm:$0xff] }
  0xa6   :  { %v2046_v45 = vpack.c.bf16 %v238_v40, %v234_v39  ;;  %v235_v48 = vld [vmem:[#allocation5 + $0x390] sm:$0xff]  ;;  %v2242_v49 = vpack.c.bf16 %v240_v42, %v236_v41  ;;  %v242_v51 = vld [vmem:[#allocation5 + $0x3c8] sm:$0xff]  ;;  %v244_v53 = vld [vmem:[#allocation5 + $0x3d8] sm:$0xff]  ;;  %v2048_v55 = vpack.c.bf16 %v237_v47, %v233_v46 }
  0xa7   :  { %2029 = vmatpush1.bf16.msra.mxu0 %v2028_v58  ;;  %v239_v50 = vld [vmem:[#allocation5 + $0x3b0] sm:$0xff]  ;;  %v246_v52 = vld [vmem:[#allocation5 + $0x3e8] sm:$0xff]  ;;  %v248_v54 = vld [vmem:[#allocation5 + $0x3f8] sm:$0xff] }
  0xa8   :  { %2225 = vmatpush1.bf16.msra.mxu1 %v2224_v59  ;;  %2031 = vmatprep.subr.bf16.mxu0 %v2030_v60  ;;  %v2244_v56 = vpack.c.bf16 %v239_v50, %v235_v48  ;;  %v2050_v57 = vpack.c.bf16 %v246_v52, %v242_v51  ;;  %v241_v58 = vld [vmem:[#allocation5 + $0x3c0] sm:$0xff]  ;;  %v243_v60 = vld [vmem:[#allocation5 + $0x3d0] sm:$0xff]  ;;  %v2246_v61 = vpack.c.bf16 %v248_v54, %v244_v53  ;;  %v250_v63 = vld [vmem:[#allocation5 + $0x408] sm:$0xff] }
  0xa9   :  { %2227 = vmatprep.subr.bf16.mxu1 %v2226_v0  ;;  %v245_v59 = vld [vmem:[#allocation5 + $0x3e0] sm:$0xff]  ;;  %v247_v62 = vld [vmem:[#allocation5 + $0x3f0] sm:$0xff]  ;;  %v254_v0 = vld [vmem:[#allocation5 + $0x428] sm:$0xff] }
  0xaa   :  { %v252_v1 = vld [vmem:[#allocation5 + $0x418] sm:$0xff]  ;;  %v2052_v3 = vpack.c.bf16 %v245_v59, %v241_v58  ;;  %v2248_v4 = vpack.c.bf16 %v247_v62, %v243_v60  ;;  %v2054_v5 = vpack.c.bf16 %v254_v0, %v250_v63  ;;  %v253_v7 = vld [vmem:[#allocation5 + $0x420] sm:$0xff]  ;;  %v255_v10 = vld [vmem:[#allocation5 + $0x430] sm:$0xff] }
  0xab   :  { %2033 = vmatpush1.bf16.msra.mxu0 %v2032_v6  ;;  %v256_v2 = vld [vmem:[#allocation5 + $0x438] sm:$0xff]  ;;  %v249_v6 = vld [vmem:[#allocation5 + $0x400] sm:$0xff]  ;;  %v258_v11 = vld [vmem:[#allocation5 + $0x448] sm:$0xff] }
  0xac   :  { %2229 = vmatpush1.bf16.msra.mxu1 %v2228_v8  ;;  %2035 = vmatprep.subr.bf16.mxu0 %v2034_v9  ;;  %v251_v8 = vld [vmem:[#allocation5 + $0x410] sm:$0xff]  ;;  %v2250_v9 = vpack.c.bf16 %v256_v2, %v252_v1  ;;  %v262_v12 = vld [vmem:[#allocation5 + $0x468] sm:$0xff]  ;;  %v264_v14 = vld [vmem:[#allocation5 + $0x478] sm:$0xff]  ;;  %v2056_v16 = vpack.c.bf16 %v253_v7, %v249_v6 }
  0xad   :  { %2231 = vmatprep.subr.bf16.mxu1 %v2230_v13  ;;  %v260_v13 = vld [vmem:[#allocation5 + $0x458] sm:$0xff]  ;;  %v114_v15 = vld [vmem:[#allocation2] sm:$0xff]  ;;  %v2252_v17 = vpack.c.bf16 %v255_v10, %v251_v8  ;;  %v2058_v18 = vpack.c.bf16 %v262_v12, %v258_v11  ;;  %v263_v23 = vld [vmem:[#allocation5 + $0x470] sm:$0xff] }
  0xae   :  { %v2254_v22 = vpack.c.bf16 %v264_v14, %v260_v13  ;;  %v266_v24 = vld [vmem:[#allocation5 + $0x488] sm:$0xff]  ;;  %v268_v26 = vld [vmem:[#allocation5 + $0x498] sm:$0xff]  ;;  %v271_v35 = vld [vmem:[#allocation5 + $0x4b0] sm:$0xff] }
  0xaf   :  { %2037 = vmatpush1.bf16.msra.mxu0 %v2036_v19  ;;  %v257_v19 = vld [vmem:[#allocation5 + $0x440] sm:$0xff]  ;;  %v272_v27 = vld [vmem:[#allocation5 + $0x4b8] sm:$0xff]  ;;  %v274_v36 = vld [vmem:[#allocation5 + $0x4c8] sm:$0xff] }
  0xb0   :  { %2233 = vmatpush1.bf16.msra.mxu1 %v2232_v20  ;;  %2039 = vmatprep.subr.bf16.mxu0 %v2038_v21  ;;  %v261_v20 = vld [vmem:[#allocation5 + $0x460] sm:$0xff]  ;;  %v259_v21 = vld [vmem:[#allocation5 + $0x450] sm:$0xff]  ;;  %v2258_v34 = vpack.c.bf16 %v272_v27, %v268_v26  ;;  %v276_v38 = vld [vmem:[#allocation5 + $0x4d8] sm:$0xff] }
  0xb1   :  { %2235 = vmatprep.subr.bf16.mxu1 %v2234_v25  ;;  %v270_v25 = vld [vmem:[#allocation5 + $0x4a8] sm:$0xff]  ;;  %v2060_v28 = vpack.c.bf16 %v261_v20, %v257_v19  ;;  %v2256_v29 = vpack.c.bf16 %v263_v23, %v259_v21  ;;  %v280_v39 = vld [vmem:[#allocation5 + $0x4f8] sm:$0xff]  ;;  %v279_v47 = vld [vmem:[#allocation5 + $0x4f0] sm:$0xff] }
  0xb2   :  { %v2062_v30 = vpack.c.bf16 %v270_v25, %v266_v24  ;;  %v2262_v46 = vpack.c.bf16 %v280_v39, %v276_v38  ;;  %v282_v48 = vld [vmem:[#allocation5 + $0x508] sm:$0xff]  ;;  %v284_v50 = vld [vmem:[#allocation5 + $0x518] sm:$0xff]  ;;  %v287_v59 = vld [vmem:[#allocation5 + $0x530] sm:$0xff] }
  0xb3   :  { %2041 = vmatpush1.bf16.msra.mxu0 %v2040_v31  ;;  %v265_v31 = vld [vmem:[#allocation5 + $0x480] sm:$0xff]  ;;  %v288_v51 = vld [vmem:[#allocation5 + $0x538] sm:$0xff]  ;;  %v290_v60 = vld [vmem:[#allocation5 + $0x548] sm:$0xff] }
  0xb4   :  { %2237 = vmatpush1.bf16.msra.mxu1 %v2236_v32  ;;  %2043 = vmatprep.subr.bf16.mxu0 %v2042_v33  ;;  %v269_v32 = vld [vmem:[#allocation5 + $0x4a0] sm:$0xff]  ;;  %v267_v33 = vld [vmem:[#allocation5 + $0x490] sm:$0xff]  ;;  %v2266_v58 = vpack.c.bf16 %v288_v51, %v284_v50  ;;  %v292_v62 = vld [vmem:[#allocation5 + $0x558] sm:$0xff] }
  0xb5   :  { %2239 = vmatprep.subr.bf16.mxu1 %v2238_v37  ;;  %v278_v37 = vld [vmem:[#allocation5 + $0x4e8] sm:$0xff]  ;;  %v2064_v40 = vpack.c.bf16 %v269_v32, %v265_v31  ;;  %v2260_v41 = vpack.c.bf16 %v271_v35, %v267_v33  ;;  %v296_v63 = vld [vmem:[#allocation5 + $0x578] sm:$0xff]  ;;  %v295_v7 = vld [vmem:[#allocation5 + $0x570] sm:$0xff] }
  0xb6   :  { %v2066_v42 = vpack.c.bf16 %v278_v37, %v274_v36  ;;  %v2270_v6 = vpack.c.bf16 %v296_v63, %v292_v62  ;;  %v298_v8 = vld [vmem:[#allocation5 + $0x588] sm:$0xff]  ;;  %v300_v10 = vld [vmem:[#allocation5 + $0x598] sm:$0xff]  ;;  %v297_v13 = vld [vmem:[#allocation5 + $0x580] sm:$0xff] }
  0xb7   :  { %2045 = vmatpush1.bf16.msra.mxu0 %v2044_v43  ;;  %v273_v43 = vld [vmem:[#allocation5 + $0x4c0] sm:$0xff]  ;;  %v304_v11 = vld [vmem:[#allocation5 + $0x5b8] sm:$0xff]  ;;  %v306_v20 = vld [vmem:[#allocation5 + $0x5c8] sm:$0xff] }
  0xb8   :  { %2241 = vmatpush1.bf16.msra.mxu1 %v2240_v44  ;;  %2047 = vmatprep.subr.bf16.mxu0 %v2046_v45  ;;  %v277_v44 = vld [vmem:[#allocation5 + $0x4e0] sm:$0xff]  ;;  %v275_v45 = vld [vmem:[#allocation5 + $0x4d0] sm:$0xff]  ;;  %v2274_v19 = vpack.c.bf16 %v304_v11, %v300_v10  ;;  %v310_v21 = vld [vmem:[#allocation5 + $0x5e8] sm:$0xff] }
  0xb9   :  { %2243 = vmatprep.subr.bf16.mxu1 %v2242_v49  ;;  %v286_v49 = vld [vmem:[#allocation5 + $0x528] sm:$0xff]  ;;  %v2068_v52 = vpack.c.bf16 %v277_v44, %v273_v43  ;;  %v2264_v53 = vpack.c.bf16 %v279_v47, %v275_v45  ;;  %v308_v23 = vld [vmem:[#allocation5 + $0x5d8] sm:$0xff]  ;;  %v2082_v27 = vpack.c.bf16 %v310_v21, %v306_v20  ;;  %v311_v32 = vld [vmem:[#allocation5 + $0x5f0] sm:$0xff] }
  0xba   :  { %v2070_v54 = vpack.c.bf16 %v286_v49, %v282_v48  ;;  %v312_v24 = vld [vmem:[#allocation5 + $0x5f8] sm:$0xff]  ;;  %v314_v33 = vld [vmem:[#allocation5 + $0x608] sm:$0xff]  ;;  %v319_v44 = vld [vmem:[#allocation5 + $0x630] sm:$0xff] }
  0xbb   :  { %2049 = vmatpush1.bf16.msra.mxu0 %v2048_v55  ;;  %v281_v55 = vld [vmem:[#allocation5 + $0x500] sm:$0xff]  ;;  %v2278_v31 = vpack.c.bf16 %v312_v24, %v308_v23  ;;  %v316_v35 = vld [vmem:[#allocation5 + $0x618] sm:$0xff]  ;;  %v322_v45 = vld [vmem:[#allocation5 + $0x648] sm:$0xff] }
  0xbc   :  { %2245 = vmatpush1.bf16.msra.mxu1 %v2244_v56  ;;  %2051 = vmatprep.subr.bf16.mxu0 %v2050_v57  ;;  %v285_v56 = vld [vmem:[#allocation5 + $0x520] sm:$0xff]  ;;  %v283_v57 = vld [vmem:[#allocation5 + $0x510] sm:$0xff]  ;;  %v320_v36 = vld [vmem:[#allocation5 + $0x638] sm:$0xff] }
  0xbd   :  { %2247 = vmatprep.subr.bf16.mxu1 %v2246_v61  ;;  %v294_v61 = vld [vmem:[#allocation5 + $0x568] sm:$0xff]  ;;  %v2072_v0 = vpack.c.bf16 %v285_v56, %v281_v55  ;;  %v2268_v1 = vpack.c.bf16 %v287_v59, %v283_v57  ;;  %v2282_v43 = vpack.c.bf16 %v320_v36, %v316_v35  ;;  %v324_v47 = vld [vmem:[#allocation5 + $0x658] sm:$0xff]  ;;  %v327_v56 = vld [vmem:[#allocation5 + $0x670] sm:$0xff] }
  0xbe   :  { %v2074_v2 = vpack.c.bf16 %v294_v61, %v290_v60  ;;  %v328_v48 = vld [vmem:[#allocation5 + $0x678] sm:$0xff]  ;;  %v330_v57 = vld [vmem:[#allocation5 + $0x688] sm:$0xff]  ;;  %v345_v24 = vld [vmem:[#allocation5 + $0x700] sm:$0xff] }
  0xbf   :  { %2053 = vmatpush1.bf16.msra.mxu0 %v2052_v3  ;;  %v289_v3 = vld [vmem:[#allocation5 + $0x540] sm:$0xff]  ;;  %v2286_v55 = vpack.c.bf16 %v328_v48, %v324_v47  ;;  %v332_v59 = vld [vmem:[#allocation5 + $0x698] sm:$0xff] }
  0xc0   :  { %2249 = vmatpush1.bf16.msra.mxu1 %v2248_v4  ;;  %2055 = vmatprep.subr.bf16.mxu0 %v2054_v5  ;;  %v293_v4 = vld [vmem:[#allocation5 + $0x560] sm:$0xff]  ;;  %v291_v5 = vld [vmem:[#allocation5 + $0x550] sm:$0xff]  ;;  %v336_v60 = vld [vmem:[#allocation5 + $0x6b8] sm:$0xff] }
  0xc1   :  { %2251 = vmatprep.subr.bf16.mxu1 %v2250_v9  ;;  %v302_v9 = vld [vmem:[#allocation5 + $0x5a8] sm:$0xff]  ;;  %v2076_v12 = vpack.c.bf16 %v293_v4, %v289_v3  ;;  %v2272_v14 = vpack.c.bf16 %v295_v7, %v291_v5  ;;  %v2290_v3 = vpack.c.bf16 %v336_v60, %v332_v59  ;;  %v335_v4 = vld [vmem:[#allocation5 + $0x6b0] sm:$0xff]  ;;  %v340_v7 = vld [vmem:[#allocation5 + $0x6d8] sm:$0xff] }
  0xc2   :  { %604 = vmatmul.mubr.f32.vlgmr.msra.gmra.mrb[0].mxu0 %v114_v15  ;;  %v338_v5 = vld [vmem:[#allocation5 + $0x6c8] sm:$0xff]  ;;  %v352_v20 = vld [vmem:[#allocation5 + $0x738] sm:$0xff]  ;;  %v353_v36 = vld [vmem:[#allocation5 + $0x740] sm:$0xff] }
  0xc3   :  { %2057 = vmatpush1.bf16.msra.mxu0 %v2056_v16  ;;  %888 = vmatmul.mubr.f32.vlgmr.msra.gmra.mrb[0].mxu1 %v114_v15  ;;  %v2078_v15 = vpack.c.bf16 %v302_v9, %v298_v8  ;;  %v301_v16 = vld [vmem:[#allocation5 + $0x5a0] sm:$0xff]  ;;  %v344_v8 = vld [vmem:[#allocation5 + $0x6f8] sm:$0xff] }
  0xc4   :  { %2253 = vmatpush1.bf16.msra.mxu1 %v2252_v17  ;;  %2059 = vmatprep.subr.bf16.mxu0 %v2058_v18  ;;  %v299_v17 = vld [vmem:[#allocation5 + $0x590] sm:$0xff]  ;;  %v2080_v25 = vpack.c.bf16 %v301_v16, %v297_v13  ;;  %v341_v13 = vld [vmem:[#allocation5 + $0x6e0] sm:$0xff] }
  0xc5   :  { %2255 = vmatprep.subr.bf16.mxu1 %v2254_v22  ;;  %v303_v18 = vld [vmem:[#allocation5 + $0x5b0] sm:$0xff]  ;;  %v117_v22 = vld [vmem:[#allocation2 + $0x18] sm:$0xff] }
  0xc6   :  { %674 = vmatprep.mubr.f32.mxu0 %v117_v22  ;;  %958 = vmatprep.mubr.f32.mxu1 %v117_v22  ;;  %v2276_v26 = vpack.c.bf16 %v303_v18, %v299_v17  ;;  %v343_v16 = vld [vmem:[#allocation5 + $0x6f0] sm:$0xff]  ;;  %v346_v17 = vld [vmem:[#allocation5 + $0x708] sm:$0xff]  ;;  %v361_v48 = vld [vmem:[#allocation5 + $0x780] sm:$0xff] }
  0xc7   :  { %2061 = vmatpush1.bf16.msra.mxu0 %v2060_v28  ;;  %v305_v28 = vld [vmem:[#allocation5 + $0x5c0] sm:$0xff]  ;;  %v350_v18 = vld [vmem:[#allocation5 + $0x728] sm:$0xff] }
  0xc8   :  { %2257 = vmatpush1.bf16.msra.mxu1 %v2256_v29  ;;  %2063 = vmatprep.subr.bf16.mxu0 %v2062_v30  ;;  %v309_v29 = vld [vmem:[#allocation5 + $0x5e0] sm:$0xff]  ;;  %v307_v30 = vld [vmem:[#allocation5 + $0x5d0] sm:$0xff]  ;;  %v2102_v23 = vpack.c.bf16 %v350_v18, %v346_v17  ;;  %v116_v17 = vld [vmem:[#allocation2 + $0x10] sm:$0xff] }
  0xc9   :  { %2259 = vmatprep.subr.bf16.mxu1 %v2258_v34  ;;  %v318_v34 = vld [vmem:[#allocation5 + $0x628] sm:$0xff]  ;;  %v2084_v37 = vpack.c.bf16 %v309_v29, %v305_v28  ;;  %v2280_v38 = vpack.c.bf16 %v311_v32, %v307_v30  ;;  %v351_v28 = vld [vmem:[#allocation5 + $0x730] sm:$0xff]  ;;  %v360_v32 = vld [vmem:[#allocation5 + $0x778] sm:$0xff] }
  0xca   :  { %v2086_v39 = vpack.c.bf16 %v318_v34, %v314_v33  ;;  %v354_v29 = vld [vmem:[#allocation5 + $0x748] sm:$0xff]  ;;  %v369_v60 = vld [vmem:[#allocation5 + $0x7c0] sm:$0xff] }
  0xcb   :  { %2065 = vmatpush1.bf16.msra.mxu0 %v2064_v40  ;;  %v313_v40 = vld [vmem:[#allocation5 + $0x600] sm:$0xff]  ;;  %v358_v30 = vld [vmem:[#allocation5 + $0x768] sm:$0xff] }
  0xcc   :  { %2261 = vmatpush1.bf16.msra.mxu1 %v2260_v41  ;;  %2067 = vmatprep.subr.bf16.mxu0 %v2066_v42  ;;  %v317_v41 = vld [vmem:[#allocation5 + $0x620] sm:$0xff]  ;;  %v315_v42 = vld [vmem:[#allocation5 + $0x610] sm:$0xff]  ;;  %v2106_v35 = vpack.c.bf16 %v358_v30, %v354_v29  ;;  %v400_v29 = vld [vmem:[#allocation5 + $0x8b8] sm:$0xff] }
  0xcd   :  { %2263 = vmatprep.subr.bf16.mxu1 %v2262_v46  ;;  %v326_v46 = vld [vmem:[#allocation5 + $0x668] sm:$0xff]  ;;  %v2088_v49 = vpack.c.bf16 %v317_v41, %v313_v40  ;;  %v2284_v50 = vpack.c.bf16 %v319_v44, %v315_v42  ;;  %v359_v40 = vld [vmem:[#allocation5 + $0x770] sm:$0xff]  ;;  %v368_v44 = vld [vmem:[#allocation5 + $0x7b8] sm:$0xff] }
  0xce   :  { %v2090_v51 = vpack.c.bf16 %v326_v46, %v322_v45  ;;  %v362_v41 = vld [vmem:[#allocation5 + $0x788] sm:$0xff]  ;;  %v119_v30 = vld [vmem:[#allocation2 + $0x28] sm:$0xff] }
  0xcf   :  { %2069 = vmatpush1.bf16.msra.mxu0 %v2068_v52  ;;  %v321_v52 = vld [vmem:[#allocation5 + $0x640] sm:$0xff]  ;;  %v366_v42 = vld [vmem:[#allocation5 + $0x7a8] sm:$0xff] }
  0xd0   :  { %2265 = vmatpush1.bf16.msra.mxu1 %v2264_v53  ;;  %2071 = vmatprep.subr.bf16.mxu0 %v2070_v54  ;;  %v325_v53 = vld [vmem:[#allocation5 + $0x660] sm:$0xff]  ;;  %v323_v54 = vld [vmem:[#allocation5 + $0x650] sm:$0xff]  ;;  %v2110_v47 = vpack.c.bf16 %v366_v42, %v362_v41  ;;  %v404_v41 = vld [vmem:[#allocation5 + $0x8d8] sm:$0xff] }
  0xd1   :  { %2267 = vmatprep.subr.bf16.mxu1 %v2266_v58  ;;  %v334_v58 = vld [vmem:[#allocation5 + $0x6a8] sm:$0xff]  ;;  %v2092_v61 = vpack.c.bf16 %v325_v53, %v321_v52  ;;  %v2288_v62 = vpack.c.bf16 %v327_v56, %v323_v54  ;;  %v367_v52 = vld [vmem:[#allocation5 + $0x7b0] sm:$0xff]  ;;  %v376_v56 = vld [vmem:[#allocation5 + $0x7f8] sm:$0xff] }
  0xd2   :  { %v2094_v63 = vpack.c.bf16 %v334_v58, %v330_v57  ;;  %v370_v53 = vld [vmem:[#allocation5 + $0x7c8] sm:$0xff]  ;;  %v408_v42 = vld [vmem:[#allocation5 + $0x8f8] sm:$0xff] }
  0xd3   :  { %2073 = vmatpush1.bf16.msra.mxu0 %v2072_v0  ;;  %v329_v0 = vld [vmem:[#allocation5 + $0x680] sm:$0xff]  ;;  %v374_v54 = vld [vmem:[#allocation5 + $0x7e8] sm:$0xff] }
  0xd4   :  { %2269 = vmatpush1.bf16.msra.mxu1 %v2268_v1  ;;  %2075 = vmatprep.subr.bf16.mxu0 %v2074_v2  ;;  %v333_v1 = vld [vmem:[#allocation5 + $0x6a0] sm:$0xff]  ;;  %v331_v2 = vld [vmem:[#allocation5 + $0x690] sm:$0xff]  ;;  %v2114_v59 = vpack.c.bf16 %v374_v54, %v370_v53  ;;  %v412_v53 = vld [vmem:[#allocation5 + $0x918] sm:$0xff] }
  0xd5   :  { %2271 = vmatprep.subr.bf16.mxu1 %v2270_v6  ;;  %v342_v6 = vld [vmem:[#allocation5 + $0x6e8] sm:$0xff]  ;;  %v2096_v9 = vpack.c.bf16 %v333_v1, %v329_v0  ;;  %v2292_v10 = vpack.c.bf16 %v335_v4, %v331_v2  ;;  %v375_v0 = vld [vmem:[#allocation5 + $0x7f0] sm:$0xff]  ;;  %v384_v4 = vld [vmem:[#allocation5 + $0x838] sm:$0xff] }
  0xd6   :  { %v2098_v11 = vpack.c.bf16 %v342_v6, %v338_v5  ;;  %v378_v1 = vld [vmem:[#allocation5 + $0x808] sm:$0xff]  ;;  %v416_v54 = vld [vmem:[#allocation5 + $0x938] sm:$0xff] }
  0xd7   :  { %2077 = vmatpush1.bf16.msra.mxu0 %v2076_v12  ;;  %v337_v12 = vld [vmem:[#allocation5 + $0x6c0] sm:$0xff]  ;;  %v382_v2 = vld [vmem:[#allocation5 + $0x828] sm:$0xff] }
  0xd8   :  { %2273 = vmatpush1.bf16.msra.mxu1 %v2272_v14  ;;  %2079 = vmatprep.subr.bf16.mxu0 %v2078_v15  ;;  %v339_v14 = vld [vmem:[#allocation5 + $0x6d0] sm:$0xff]  ;;  %v2294_v15 = vpack.c.bf16 %v344_v8, %v340_v7  ;;  %v2100_v21 = vpack.c.bf16 %v341_v13, %v337_v12  ;;  %v2118_v7 = vpack.c.bf16 %v382_v2, %v378_v1  ;;  %v377_v8 = vld [vmem:[#allocation5 + $0x800] sm:$0xff]  ;;  %v386_v13 = vld [vmem:[#allocation5 + $0x848] sm:$0xff] }
  0xd9   :  { %2275 = vmatprep.subr.bf16.mxu1 %v2274_v19  ;;  %v348_v19 = vld [vmem:[#allocation5 + $0x718] sm:$0xff]  ;;  %v2296_v22 = vpack.c.bf16 %v343_v16, %v339_v14  ;;  %v383_v12 = vld [vmem:[#allocation5 + $0x830] sm:$0xff]  ;;  %v390_v14 = vld [vmem:[#allocation5 + $0x868] sm:$0xff] }
  0xda   :  { %v392_v16 = vld [vmem:[#allocation5 + $0x878] sm:$0xff] }
  0xdb   :  { %2081 = vmatpush1.bf16.msra.mxu0 %v2080_v25  ;;  %v349_v25 = vld [vmem:[#allocation5 + $0x720] sm:$0xff]  ;;  %v420_v1 = vld [vmem:[#allocation5 + $0x958] sm:$0xff] }
  0xdc   :  { %2277 = vmatpush1.bf16.msra.mxu1 %v2276_v26  ;;  %2083 = vmatprep.subr.bf16.mxu0 %v2082_v27  ;;  %v347_v26 = vld [vmem:[#allocation5 + $0x710] sm:$0xff]  ;;  %v2298_v27 = vpack.c.bf16 %v352_v20, %v348_v19  ;;  %v2104_v33 = vpack.c.bf16 %v349_v25, %v345_v24  ;;  %v2122_v20 = vpack.c.bf16 %v390_v14, %v386_v13  ;;  %v424_v2 = vld [vmem:[#allocation5 + $0x978] sm:$0xff] }
  0xdd   :  { %2279 = vmatprep.subr.bf16.mxu1 %v2278_v31  ;;  %v356_v31 = vld [vmem:[#allocation5 + $0x758] sm:$0xff]  ;;  %v2300_v34 = vpack.c.bf16 %v351_v28, %v347_v26  ;;  %v391_v25 = vld [vmem:[#allocation5 + $0x870] sm:$0xff]  ;;  %v394_v26 = vld [vmem:[#allocation5 + $0x888] sm:$0xff] }
  0xde   :  { %v396_v28 = vld [vmem:[#allocation5 + $0x898] sm:$0xff] }
  0xdf   :  { %2085 = vmatpush1.bf16.msra.mxu0 %v2084_v37  ;;  %v357_v37 = vld [vmem:[#allocation5 + $0x760] sm:$0xff]  ;;  %v428_v13 = vld [vmem:[#allocation5 + $0x998] sm:$0xff] }
  0xe0   :  { %2281 = vmatpush1.bf16.msra.mxu1 %v2280_v38  ;;  %2087 = vmatprep.subr.bf16.mxu0 %v2086_v39  ;;  %v355_v38 = vld [vmem:[#allocation5 + $0x750] sm:$0xff]  ;;  %v2302_v39 = vpack.c.bf16 %v360_v32, %v356_v31  ;;  %v2108_v45 = vpack.c.bf16 %v357_v37, %v353_v36  ;;  %v2322_v37 = vpack.c.bf16 %v400_v29, %v396_v28  ;;  %v432_v14 = vld [vmem:[#allocation5 + $0x9b8] sm:$0xff] }
  0xe1   :  { %2283 = vmatprep.subr.bf16.mxu1 %v2282_v43  ;;  %v364_v43 = vld [vmem:[#allocation5 + $0x798] sm:$0xff]  ;;  %v2304_v46 = vpack.c.bf16 %v359_v40, %v355_v38  ;;  %v395_v36 = vld [vmem:[#allocation5 + $0x890] sm:$0xff]  ;;  %v406_v40 = vld [vmem:[#allocation5 + $0x8e8] sm:$0xff] }
  0xe2   :  { %v399_v38 = vld [vmem:[#allocation5 + $0x8b0] sm:$0xff] }
  0xe3   :  { %2089 = vmatpush1.bf16.msra.mxu0 %v2088_v49  ;;  %v365_v49 = vld [vmem:[#allocation5 + $0x7a0] sm:$0xff] }
  0xe4   :  { %2285 = vmatpush1.bf16.msra.mxu1 %v2284_v50  ;;  %2091 = vmatprep.subr.bf16.mxu0 %v2090_v51  ;;  %v363_v50 = vld [vmem:[#allocation5 + $0x790] sm:$0xff]  ;;  %v2306_v51 = vpack.c.bf16 %v368_v44, %v364_v43  ;;  %v2112_v57 = vpack.c.bf16 %v365_v49, %v361_v48  ;;  %v2324_v44 = vpack.c.bf16 %v399_v38, %v395_v36  ;;  %v446_v36 = vld [vmem:[#allocation5 + $0xa28] sm:$0xff]  ;;  %v448_v38 = vld [vmem:[#allocation5 + $0xa38] sm:$0xff] }
  0xe5   :  { %2287 = vmatprep.subr.bf16.mxu1 %v2286_v55  ;;  %v372_v55 = vld [vmem:[#allocation5 + $0x7d8] sm:$0xff]  ;;  %v2308_v58 = vpack.c.bf16 %v367_v52, %v363_v50  ;;  %v403_v48 = vld [vmem:[#allocation5 + $0x8d0] sm:$0xff]  ;;  %v2326_v49 = vpack.c.bf16 %v408_v42, %v404_v41  ;;  %v414_v52 = vld [vmem:[#allocation5 + $0x928] sm:$0xff] }
  0xe6   :  { %v407_v50 = vld [vmem:[#allocation5 + $0x8f0] sm:$0xff]  ;;  %v441_v42 = vld [vmem:[#allocation5 + $0xa00] sm:$0xff] }
  0xe7   :  { %2093 = vmatpush1.bf16.msra.mxu0 %v2092_v61  ;;  %v373_v61 = vld [vmem:[#allocation5 + $0x7e0] sm:$0xff] }
  0xe8   :  { %2289 = vmatpush1.bf16.msra.mxu1 %v2288_v62  ;;  %2095 = vmatprep.subr.bf16.mxu0 %v2094_v63  ;;  %v371_v62 = vld [vmem:[#allocation5 + $0x7d0] sm:$0xff]  ;;  %v2310_v63 = vpack.c.bf16 %v376_v56, %v372_v55  ;;  %v2116_v5 = vpack.c.bf16 %v373_v61, %v369_v60  ;;  %v2328_v56 = vpack.c.bf16 %v407_v50, %v403_v48  ;;  %v454_v48 = vld [vmem:[#allocation5 + $0xa68] sm:$0xff]  ;;  %v456_v50 = vld [vmem:[#allocation5 + $0xa78] sm:$0xff] }
  0xe9   :  { %2291 = vmatprep.subr.bf16.mxu1 %v2290_v3  ;;  %v380_v3 = vld [vmem:[#allocation5 + $0x818] sm:$0xff]  ;;  %v2312_v6 = vpack.c.bf16 %v375_v0, %v371_v62  ;;  %v411_v60 = vld [vmem:[#allocation5 + $0x910] sm:$0xff]  ;;  %v2330_v61 = vpack.c.bf16 %v416_v54, %v412_v53  ;;  %v422_v0 = vld [vmem:[#allocation5 + $0x968] sm:$0xff] }
  0xea   :  { %v415_v62 = vld [vmem:[#allocation5 + $0x930] sm:$0xff]  ;;  %v449_v54 = vld [vmem:[#allocation5 + $0xa40] sm:$0xff] }
  0xeb   :  { %2097 = vmatpush1.bf16.msra.mxu0 %v2096_v9  ;;  %v381_v9 = vld [vmem:[#allocation5 + $0x820] sm:$0xff] }
  0xec   :  { %2293 = vmatpush1.bf16.msra.mxu1 %v2292_v10  ;;  %2099 = vmatprep.subr.bf16.mxu0 %v2098_v11  ;;  %v379_v10 = vld [vmem:[#allocation5 + $0x810] sm:$0xff]  ;;  %v2314_v11 = vpack.c.bf16 %v384_v4, %v380_v3  ;;  %v2120_v18 = vpack.c.bf16 %v381_v9, %v377_v8  ;;  %v2332_v4 = vpack.c.bf16 %v415_v62, %v411_v60  ;;  %v462_v60 = vld [vmem:[#allocation5 + $0xaa8] sm:$0xff]  ;;  %v464_v62 = vld [vmem:[#allocation5 + $0xab8] sm:$0xff] }
  0xed   :  { %2295 = vmatprep.subr.bf16.mxu1 %v2294_v15  ;;  %v388_v15 = vld [vmem:[#allocation5 + $0x858] sm:$0xff]  ;;  %v2316_v19 = vpack.c.bf16 %v383_v12, %v379_v10  ;;  %v419_v8 = vld [vmem:[#allocation5 + $0x950] sm:$0xff]  ;;  %v2334_v9 = vpack.c.bf16 %v424_v2, %v420_v1  ;;  %v430_v12 = vld [vmem:[#allocation5 + $0x9a8] sm:$0xff] }
  0xee   :  { %v2318_v24 = vpack.c.bf16 %v392_v16, %v388_v15  ;;  %v423_v10 = vld [vmem:[#allocation5 + $0x970] sm:$0xff]  ;;  %v457_v2 = vld [vmem:[#allocation5 + $0xa80] sm:$0xff] }
  0xef   :  { %2101 = vmatpush1.bf16.msra.mxu0 %v2100_v21  ;;  %v385_v21 = vld [vmem:[#allocation5 + $0x840] sm:$0xff]  ;;  %v2336_v16 = vpack.c.bf16 %v423_v10, %v419_v8  ;;  %v470_v8 = vld [vmem:[#allocation5 + $0xae8] sm:$0xff]  ;;  %v472_v10 = vld [vmem:[#allocation5 + $0xaf8] sm:$0xff] }
  0xf0   :  { %2297 = vmatpush1.bf16.msra.mxu1 %v2296_v22  ;;  %2103 = vmatprep.subr.bf16.mxu0 %v2102_v23  ;;  %v389_v22 = vld [vmem:[#allocation5 + $0x860] sm:$0xff]  ;;  %v387_v23 = vld [vmem:[#allocation5 + $0x850] sm:$0xff] }
  0xf1   :  { %2299 = vmatprep.subr.bf16.mxu1 %v2298_v27  ;;  %v398_v27 = vld [vmem:[#allocation5 + $0x8a8] sm:$0xff]  ;;  %v2124_v31 = vpack.c.bf16 %v389_v22, %v385_v21  ;;  %v2320_v32 = vpack.c.bf16 %v391_v25, %v387_v23  ;;  %v2338_v21 = vpack.c.bf16 %v432_v14, %v428_v13  ;;  %v431_v22 = vld [vmem:[#allocation5 + $0x9b0] sm:$0xff]  ;;  %v436_v25 = vld [vmem:[#allocation5 + $0x9d8] sm:$0xff] }
  0xf2   :  { %v434_v23 = vld [vmem:[#allocation5 + $0x9c8] sm:$0xff]  ;;  %v465_v14 = vld [vmem:[#allocation5 + $0xac0] sm:$0xff] }
  0xf3   :  { %2105 = vmatpush1.bf16.msra.mxu0 %v2104_v33  ;;  %v2126_v33 = vpack.c.bf16 %v398_v27, %v394_v26  ;;  %v440_v26 = vld [vmem:[#allocation5 + $0x9f8] sm:$0xff] }
  0xf4   :  { %2301 = vmatpush1.bf16.msra.mxu1 %v2300_v34  ;;  %2107 = vmatprep.subr.bf16.mxu0 %v2106_v35  ;;  %v393_v34 = vld [vmem:[#allocation5 + $0x880] sm:$0xff] }
  0xf5   :  { %2303 = vmatprep.subr.bf16.mxu1 %v2302_v39  ;;  %v397_v35 = vld [vmem:[#allocation5 + $0x8a0] sm:$0xff]  ;;  %v402_v39 = vld [vmem:[#allocation5 + $0x8c8] sm:$0xff] }
  0xf6   :  { %v2128_v43 = vpack.c.bf16 %v397_v35, %v393_v34  ;;  %v439_v34 = vld [vmem:[#allocation5 + $0x9f0] sm:$0xff]  ;;  %v442_v35 = vld [vmem:[#allocation5 + $0xa08] sm:$0xff] }
  0xf7   :  { %2109 = vmatpush1.bf16.msra.mxu0 %v2108_v45  ;;  %v2130_v45 = vpack.c.bf16 %v406_v40, %v402_v39  ;;  %v2150_v41 = vpack.c.bf16 %v446_v36, %v442_v35 }
  0xf8   :  { %2305 = vmatpush1.bf16.msra.mxu1 %v2304_v46  ;;  %2111 = vmatprep.subr.bf16.mxu0 %v2110_v47  ;;  %v401_v46 = vld [vmem:[#allocation5 + $0x8c0] sm:$0xff] }
  0xf9   :  { %2307 = vmatprep.subr.bf16.mxu1 %v2306_v51  ;;  %v405_v47 = vld [vmem:[#allocation5 + $0x8e0] sm:$0xff]  ;;  %v410_v51 = vld [vmem:[#allocation5 + $0x908] sm:$0xff] }
  0xfa   :  { %v2132_v55 = vpack.c.bf16 %v405_v47, %v401_v46  ;;  %v447_v46 = vld [vmem:[#allocation5 + $0xa30] sm:$0xff]  ;;  %v450_v47 = vld [vmem:[#allocation5 + $0xa48] sm:$0xff] }
  0xfb   :  { %2113 = vmatpush1.bf16.msra.mxu0 %v2112_v57  ;;  %v2134_v57 = vpack.c.bf16 %v414_v52, %v410_v51  ;;  %v2154_v53 = vpack.c.bf16 %v454_v48, %v450_v47 }
  0xfc   :  { %2309 = vmatpush1.bf16.msra.mxu1 %v2308_v58  ;;  %2115 = vmatprep.subr.bf16.mxu0 %v2114_v59  ;;  %v409_v58 = vld [vmem:[#allocation5 + $0x900] sm:$0xff] }
  0xfd   :  { %2311 = vmatprep.subr.bf16.mxu1 %v2310_v63  ;;  %v413_v59 = vld [vmem:[#allocation5 + $0x920] sm:$0xff]  ;;  %v418_v63 = vld [vmem:[#allocation5 + $0x948] sm:$0xff] }
  0xfe   :  { %v2136_v3 = vpack.c.bf16 %v413_v59, %v409_v58  ;;  %v455_v58 = vld [vmem:[#allocation5 + $0xa70] sm:$0xff]  ;;  %v458_v59 = vld [vmem:[#allocation5 + $0xa88] sm:$0xff] }
  0xff   :  { %2117 = vmatpush1.bf16.msra.mxu0 %v2116_v5  ;;  %v2138_v5 = vpack.c.bf16 %v422_v0, %v418_v63  ;;  %v2158_v1 = vpack.c.bf16 %v462_v60, %v458_v59 }
 0x100   :  { %2313 = vmatpush1.bf16.msra.mxu1 %v2312_v6  ;;  %2119 = vmatprep.subr.bf16.mxu0 %v2118_v7  ;;  %v417_v6 = vld [vmem:[#allocation5 + $0x940] sm:$0xff] }
 0x101   :  { %2315 = vmatprep.subr.bf16.mxu1 %v2314_v11  ;;  %v421_v7 = vld [vmem:[#allocation5 + $0x960] sm:$0xff]  ;;  %v426_v11 = vld [vmem:[#allocation5 + $0x988] sm:$0xff] }
 0x102   :  { %675 = vmatmul.mubr.f32.vlgmr.msra.gmra.mrb[0].mxu0 %v116_v17  ;;  %v2140_v15 = vpack.c.bf16 %v421_v7, %v417_v6  ;;  %v463_v6 = vld [vmem:[#allocation5 + $0xab0] sm:$0xff]  ;;  %v466_v7 = vld [vmem:[#allocation5 + $0xac8] sm:$0xff] }
 0x103   :  { %2121 = vmatpush1.bf16.msra.mxu0 %v2120_v18  ;;  %959 = vmatmul.mubr.f32.vlgmr.msra.gmra.mrb[0].mxu1 %v116_v17  ;;  %v2142_v17 = vpack.c.bf16 %v430_v12, %v426_v11  ;;  %v425_v18 = vld [vmem:[#allocation5 + $0x980] sm:$0xff]  ;;  %v2162_v13 = vpack.c.bf16 %v470_v8, %v466_v7 }
 0x104   :  { %2317 = vmatpush1.bf16.msra.mxu1 %v2316_v19  ;;  %2123 = vmatprep.subr.bf16.mxu0 %v2122_v20  ;;  %v429_v19 = vld [vmem:[#allocation5 + $0x9a0] sm:$0xff]  ;;  %v427_v20 = vld [vmem:[#allocation5 + $0x990] sm:$0xff] }
 0x105   :  { %2319 = vmatprep.subr.bf16.mxu1 %v2318_v24  ;;  %745 = vmatprep.mubr.f32.mxu0 %v119_v30  ;;  %v438_v24 = vld [vmem:[#allocation5 + $0x9e8] sm:$0xff]  ;;  %v2144_v27 = vpack.c.bf16 %v429_v19, %v425_v18  ;;  %v2340_v28 = vpack.c.bf16 %v431_v22, %v427_v20  ;;  %v471_v18 = vld [vmem:[#allocation5 + $0xaf0] sm:$0xff]  ;;  %v480_v22 = vld [vmem:[#allocation5 + $0xb38] sm:$0xff] }
 0x106   :  { %1029 = vmatprep.mubr.f32.mxu1 %v119_v30  ;;  %v2146_v29 = vpack.c.bf16 %v438_v24, %v434_v23  ;;  %v433_v30 = vld [vmem:[#allocation5 + $0x9c0] sm:$0xff]  ;;  %v474_v19 = vld [vmem:[#allocation5 + $0xb08] sm:$0xff] }
 0x107   :  { %2125 = vmatpush1.bf16.msra.mxu0 %v2124_v31  ;;  %v437_v31 = vld [vmem:[#allocation5 + $0x9e0] sm:$0xff]  ;;  %v478_v20 = vld [vmem:[#allocation5 + $0xb28] sm:$0xff] }
 0x108   :  { %2321 = vmatpush1.bf16.msra.mxu1 %v2320_v32  ;;  %2127 = vmatprep.subr.bf16.mxu0 %v2126_v33  ;;  %v435_v32 = vld [vmem:[#allocation5 + $0x9d0] sm:$0xff]  ;;  %v2342_v33 = vpack.c.bf16 %v440_v26, %v436_v25  ;;  %v2148_v39 = vpack.c.bf16 %v437_v31, %v433_v30  ;;  %v2166_v25 = vpack.c.bf16 %v478_v20, %v474_v19  ;;  %v473_v26 = vld [vmem:[#allocation5 + $0xb00] sm:$0xff]  ;;  %v482_v31 = vld [vmem:[#allocation5 + $0xb48] sm:$0xff] }
 0x109   :  { %2323 = vmatprep.subr.bf16.mxu1 %v2322_v37  ;;  %v444_v37 = vld [vmem:[#allocation5 + $0xa18] sm:$0xff]  ;;  %v2344_v40 = vpack.c.bf16 %v439_v34, %v435_v32  ;;  %v479_v30 = vld [vmem:[#allocation5 + $0xb30] sm:$0xff]  ;;  %v486_v32 = vld [vmem:[#allocation5 + $0xb68] sm:$0xff] }
 0x10a   :  { %v488_v34 = vld [vmem:[#allocation5 + $0xb78] sm:$0xff] }
 0x10b   :  { %2129 = vmatpush1.bf16.msra.mxu0 %v2128_v43  ;;  %v445_v43 = vld [vmem:[#allocation5 + $0xa20] sm:$0xff] }
 0x10c   :  { %2325 = vmatpush1.bf16.msra.mxu1 %v2324_v44  ;;  %2131 = vmatprep.subr.bf16.mxu0 %v2130_v45  ;;  %v443_v44 = vld [vmem:[#allocation5 + $0xa10] sm:$0xff]  ;;  %v2346_v45 = vpack.c.bf16 %v448_v38, %v444_v37  ;;  %v2152_v51 = vpack.c.bf16 %v445_v43, %v441_v42  ;;  %v2170_v37 = vpack.c.bf16 %v486_v32, %v482_v31  ;;  %v481_v38 = vld [vmem:[#allocation5 + $0xb40] sm:$0xff]  ;;  %v490_v43 = vld [vmem:[#allocation5 + $0xb88] sm:$0xff] }
 0x10d   :  { %2327 = vmatprep.subr.bf16.mxu1 %v2326_v49  ;;  %v452_v49 = vld [vmem:[#allocation5 + $0xa58] sm:$0xff]  ;;  %v2348_v52 = vpack.c.bf16 %v447_v46, %v443_v44  ;;  %v487_v42 = vld [vmem:[#allocation5 + $0xb70] sm:$0xff]  ;;  %v494_v44 = vld [vmem:[#allocation5 + $0xba8] sm:$0xff] }
 0x10e   :  { %v496_v46 = vld [vmem:[#allocation5 + $0xbb8] sm:$0xff] }
 0x10f   :  { %2133 = vmatpush1.bf16.msra.mxu0 %v2132_v55  ;;  %v453_v55 = vld [vmem:[#allocation5 + $0xa60] sm:$0xff] }
 0x110   :  { %2329 = vmatpush1.bf16.msra.mxu1 %v2328_v56  ;;  %2135 = vmatprep.subr.bf16.mxu0 %v2134_v57  ;;  %v451_v56 = vld [vmem:[#allocation5 + $0xa50] sm:$0xff]  ;;  %v2350_v57 = vpack.c.bf16 %v456_v50, %v452_v49  ;;  %v2156_v63 = vpack.c.bf16 %v453_v55, %v449_v54  ;;  %v2174_v49 = vpack.c.bf16 %v494_v44, %v490_v43  ;;  %v489_v50 = vld [vmem:[#allocation5 + $0xb80] sm:$0xff]  ;;  %v498_v55 = vld [vmem:[#allocation5 + $0xbc8] sm:$0xff] }
 0x111   :  { %2331 = vmatprep.subr.bf16.mxu1 %v2330_v61  ;;  %v460_v61 = vld [vmem:[#allocation5 + $0xa98] sm:$0xff]  ;;  %v2352_v0 = vpack.c.bf16 %v455_v58, %v451_v56  ;;  %v495_v54 = vld [vmem:[#allocation5 + $0xbb0] sm:$0xff]  ;;  %v502_v56 = vld [vmem:[#allocation5 + $0xbe8] sm:$0xff] }
 0x112   :  { %v504_v58 = vld [vmem:[#allocation5 + $0xbf8] sm:$0xff]  ;;  %v1132_v43 = vld [vmem:[#allocation8 + $0xa8] sm:$0xff] }
 0x113   :  { %2137 = vmatpush1.bf16.msra.mxu0 %v2136_v3  ;;  %v461_v3 = vld [vmem:[#allocation5 + $0xaa0] sm:$0xff] }
 0x114   :  { %2333 = vmatpush1.bf16.msra.mxu1 %v2332_v4  ;;  %2139 = vmatprep.subr.bf16.mxu0 %v2138_v5  ;;  %v459_v4 = vld [vmem:[#allocation5 + $0xa90] sm:$0xff]  ;;  %v2354_v5 = vpack.c.bf16 %v464_v62, %v460_v61  ;;  %v2160_v11 = vpack.c.bf16 %v461_v3, %v457_v2  ;;  %v2178_v61 = vpack.c.bf16 %v502_v56, %v498_v55  ;;  %v497_v62 = vld [vmem:[#allocation5 + $0xbc0] sm:$0xff]  ;;  %v506_v3 = vld [vmem:[#allocation5 + $0xc08] sm:$0xff] }
 0x115   :  { %2335 = vmatprep.subr.bf16.mxu1 %v2334_v9  ;;  %v468_v9 = vld [vmem:[#allocation5 + $0xad8] sm:$0xff]  ;;  %v2356_v12 = vpack.c.bf16 %v463_v6, %v459_v4  ;;  %v503_v2 = vld [vmem:[#allocation5 + $0xbf0] sm:$0xff]  ;;  %v510_v4 = vld [vmem:[#allocation5 + $0xc28] sm:$0xff] }
 0x116   :  { %v512_v6 = vld [vmem:[#allocation5 + $0xc38] sm:$0xff]  ;;  %v1140_v55 = vld [vmem:[#allocation8 + $0xe8] sm:$0xff] }
 0x117   :  { %2141 = vmatpush1.bf16.msra.mxu0 %v2140_v15  ;;  %v469_v15 = vld [vmem:[#allocation5 + $0xae0] sm:$0xff] }
 0x118   :  { %2337 = vmatpush1.bf16.msra.mxu1 %v2336_v16  ;;  %2143 = vmatprep.subr.bf16.mxu0 %v2142_v17  ;;  %v467_v16 = vld [vmem:[#allocation5 + $0xad0] sm:$0xff]  ;;  %v2358_v17 = vpack.c.bf16 %v472_v10, %v468_v9  ;;  %v2164_v23 = vpack.c.bf16 %v469_v15, %v465_v14  ;;  %v2182_v9 = vpack.c.bf16 %v510_v4, %v506_v3  ;;  %v505_v10 = vld [vmem:[#allocation5 + $0xc00] sm:$0xff] }
 0x119   :  { %2339 = vmatprep.subr.bf16.mxu1 %v2338_v21  ;;  %v476_v21 = vld [vmem:[#allocation5 + $0xb18] sm:$0xff]  ;;  %v2360_v24 = vpack.c.bf16 %v471_v18, %v467_v16  ;;  %v511_v14 = vld [vmem:[#allocation5 + $0xc30] sm:$0xff] }
 0x11a   :  { %v1112_v15 = vld [vmem:[#allocation8 + $0x8] sm:$0xff]  ;;  %v1114_v19 = vld [vmem:[#allocation8 + $0x18] sm:$0xff] }
 0x11b   :  { %2145 = vmatpush1.bf16.msra.mxu0 %v2144_v27  ;;  %v477_v27 = vld [vmem:[#allocation5 + $0xb20] sm:$0xff]  ;;  %v1116_v16 = vld [vmem:[#allocation8 + $0x28] sm:$0xff] }
 0x11c   :  { %2341 = vmatpush1.bf16.msra.mxu1 %v2340_v28  ;;  %2147 = vmatprep.subr.bf16.mxu0 %v2146_v29  ;;  %v475_v28 = vld [vmem:[#allocation5 + $0xb10] sm:$0xff]  ;;  %v2362_v29 = vpack.c.bf16 %v480_v22, %v476_v21  ;;  %v2168_v35 = vpack.c.bf16 %v477_v27, %v473_v26  ;;  %v1118_v20 = vld [vmem:[#allocation8 + $0x38] sm:$0xff]  ;;  %v2382_v22 = vpack.c.bf16 %v1116_v16, %v1112_v15  ;;  %v1115_v26 = vld [vmem:[#allocation8 + $0x20] sm:$0xff] }
 0x11d   :  { %2343 = vmatprep.subr.bf16.mxu1 %v2342_v33  ;;  %v484_v33 = vld [vmem:[#allocation5 + $0xb58] sm:$0xff]  ;;  %v2364_v36 = vpack.c.bf16 %v479_v30, %v475_v28  ;;  %v1124_v30 = vld [vmem:[#allocation8 + $0x68] sm:$0xff] }
 0x11e   :  { %v1113_v27 = vld [vmem:[#allocation8 + $0x10] sm:$0xff]  ;;  %v1122_v31 = vld [vmem:[#allocation8 + $0x58] sm:$0xff]  ;;  %v1148_v3 = vld [vmem:[#allocation8 + $0x128] sm:$0xff] }
 0x11f   :  { %2149 = vmatpush1.bf16.msra.mxu0 %v2148_v39  ;;  %v485_v39 = vld [vmem:[#allocation5 + $0xb60] sm:$0xff]  ;;  %v1117_v28 = vld [vmem:[#allocation8 + $0x30] sm:$0xff]  ;;  %v1156_v15 = vld [vmem:[#allocation8 + $0x168] sm:$0xff] }
 0x120   :  { %2345 = vmatpush1.bf16.msra.mxu1 %v2344_v40  ;;  %2151 = vmatprep.subr.bf16.mxu0 %v2150_v41  ;;  %v483_v40 = vld [vmem:[#allocation5 + $0xb50] sm:$0xff]  ;;  %v2366_v41 = vpack.c.bf16 %v488_v34, %v484_v33  ;;  %v2172_v47 = vpack.c.bf16 %v485_v39, %v481_v38  ;;  %v1126_v32 = vld [vmem:[#allocation8 + $0x78] sm:$0xff]  ;;  %v1123_v38 = vld [vmem:[#allocation8 + $0x60] sm:$0xff] }
 0x121   :  { %2347 = vmatprep.subr.bf16.mxu1 %v2346_v45  ;;  %v492_v45 = vld [vmem:[#allocation5 + $0xb98] sm:$0xff]  ;;  %v2368_v48 = vpack.c.bf16 %v487_v42, %v483_v40  ;;  %v2514_v40 = vpack.c.bf16 %v1126_v32, %v1122_v31  ;;  %v1128_v42 = vld [vmem:[#allocation8 + $0x88] sm:$0xff] }
 0x122   :  { %v120_v33 = vld [vmem:[#allocation2 + $0x30] sm:$0xff] }
 0x123   :  { %2153 = vmatpush1.bf16.msra.mxu0 %v2152_v51  ;;  %v493_v51 = vld [vmem:[#allocation5 + $0xba0] sm:$0xff]  ;;  %v1121_v39 = vld [vmem:[#allocation8 + $0x50] sm:$0xff] }
 0x124   :  { %2349 = vmatpush1.bf16.msra.mxu1 %v2348_v52  ;;  %2155 = vmatprep.subr.bf16.mxu0 %v2154_v53  ;;  %v491_v52 = vld [vmem:[#allocation5 + $0xb90] sm:$0xff]  ;;  %v2370_v53 = vpack.c.bf16 %v496_v46, %v492_v45  ;;  %v2176_v59 = vpack.c.bf16 %v493_v51, %v489_v50  ;;  %v1130_v44 = vld [vmem:[#allocation8 + $0x98] sm:$0xff]  ;;  %v1131_v50 = vld [vmem:[#allocation8 + $0xa0] sm:$0xff] }
 0x125   :  { %2351 = vmatprep.subr.bf16.mxu1 %v2350_v57  ;;  %v500_v57 = vld [vmem:[#allocation5 + $0xbd8] sm:$0xff]  ;;  %v2372_v60 = vpack.c.bf16 %v495_v54, %v491_v52  ;;  %v1136_v54 = vld [vmem:[#allocation8 + $0xc8] sm:$0xff] }
 0x126   :  { %v1134_v45 = vld [vmem:[#allocation8 + $0xb8] sm:$0xff]  ;;  %v1129_v51 = vld [vmem:[#allocation8 + $0x90] sm:$0xff] }
 0x127   :  { %2157 = vmatpush1.bf16.msra.mxu0 %v2156_v63  ;;  %v501_v63 = vld [vmem:[#allocation5 + $0xbe0] sm:$0xff]  ;;  %v2518_v52 = vpack.c.bf16 %v1134_v45, %v1130_v44 }
 0x128   :  { %2353 = vmatpush1.bf16.msra.mxu1 %v2352_v0  ;;  %2159 = vmatprep.subr.bf16.mxu0 %v2158_v1  ;;  %v499_v0 = vld [vmem:[#allocation5 + $0xbd0] sm:$0xff]  ;;  %v2374_v1 = vpack.c.bf16 %v504_v58, %v500_v57  ;;  %v2180_v7 = vpack.c.bf16 %v501_v63, %v497_v62  ;;  %v1138_v56 = vld [vmem:[#allocation8 + $0xd8] sm:$0xff]  ;;  %v1139_v62 = vld [vmem:[#allocation8 + $0xe0] sm:$0xff] }
 0x129   :  { %2355 = vmatprep.subr.bf16.mxu1 %v2354_v5  ;;  %v508_v5 = vld [vmem:[#allocation5 + $0xc18] sm:$0xff]  ;;  %v2376_v8 = vpack.c.bf16 %v503_v2, %v499_v0  ;;  %v1144_v2 = vld [vmem:[#allocation8 + $0x108] sm:$0xff]  ;;  %v1167_v45 = vld [vmem:[#allocation8 + $0x1c0] sm:$0xff] }
 0x12a   :  { %v1142_v57 = vld [vmem:[#allocation8 + $0xf8] sm:$0xff]  ;;  %v1137_v63 = vld [vmem:[#allocation8 + $0xd0] sm:$0xff] }
 0x12b   :  { %2161 = vmatpush1.bf16.msra.mxu0 %v2160_v11  ;;  %v509_v11 = vld [vmem:[#allocation5 + $0xc20] sm:$0xff]  ;;  %v2522_v0 = vpack.c.bf16 %v1142_v57, %v1138_v56 }
 0x12c   :  { %2357 = vmatpush1.bf16.msra.mxu1 %v2356_v12  ;;  %2163 = vmatprep.subr.bf16.mxu0 %v2162_v13  ;;  %v2378_v12 = vpack.c.bf16 %v512_v6, %v508_v5  ;;  %v507_v13 = vld [vmem:[#allocation5 + $0xc10] sm:$0xff]  ;;  %v2184_v18 = vpack.c.bf16 %v509_v11, %v505_v10  ;;  %v1146_v4 = vld [vmem:[#allocation8 + $0x118] sm:$0xff]  ;;  %v1147_v10 = vld [vmem:[#allocation8 + $0x120] sm:$0xff] }
 0x12d   :  { %2359 = vmatprep.subr.bf16.mxu1 %v2358_v17  ;;  %v118_v17 = vld [vmem:[#allocation2 + $0x20] sm:$0xff]  ;;  %v2380_v21 = vpack.c.bf16 %v511_v14, %v507_v13  ;;  %v1150_v5 = vld [vmem:[#allocation8 + $0x138] sm:$0xff]  ;;  %v1145_v11 = vld [vmem:[#allocation8 + $0x110] sm:$0xff] }
 0x12e   :  { %v1149_v13 = vld [vmem:[#allocation8 + $0x130] sm:$0xff]  ;;  %v1152_v14 = vld [vmem:[#allocation8 + $0x148] sm:$0xff]  ;;  %v1154_v16 = vld [vmem:[#allocation8 + $0x158] sm:$0xff] }
 0x12f   :  { %2165 = vmatpush1.bf16.msra.mxu0 %v2164_v23  ;;  %v2510_v23 = vpack.c.bf16 %v1118_v20, %v1114_v19  ;;  %v2528_v19 = vpack.c.bf16 %v1149_v13, %v1145_v11  ;;  %v2402_v20 = vpack.c.bf16 %v1156_v15, %v1152_v14  ;;  %v1175_v57 = vld [vmem:[#allocation8 + $0x200] sm:$0xff]  ;;  %v1196_v11 = vld [vmem:[#allocation8 + $0x2a8] sm:$0xff]  ;;  %v1198_v13 = vld [vmem:[#allocation8 + $0x2b8] sm:$0xff] }
 0x130   :  { %2361 = vmatpush1.bf16.msra.mxu1 %v2360_v24  ;;  %2167 = vmatprep.subr.bf16.mxu0 %v2166_v25  ;;  %v2940_v24 = vmov 0.0   ;;  %v1111_v25 = vld [vmem:[#allocation8] sm:$0xff] }
 0x131   :  { %2363 = vmatprep.subr.bf16.mxu1 %v2362_v29  ;;  %v1120_v29 = vld [vmem:[#allocation8 + $0x48] sm:$0xff]  ;;  %v2384_v34 = vpack.c.bf16 %v1115_v26, %v1111_v25  ;;  %v1157_v25 = vld [vmem:[#allocation8 + $0x170] sm:$0xff] }
 0x132   :  { %v1160_v26 = vld [vmem:[#allocation8 + $0x188] sm:$0xff] }
 0x133   :  { %2169 = vmatpush1.bf16.msra.mxu0 %v2168_v35  ;;  %v2512_v35 = vpack.c.bf16 %v1117_v28, %v1113_v27  ;;  %v1164_v27 = vld [vmem:[#allocation8 + $0x1a8] sm:$0xff]  ;;  %v1162_v28 = vld [vmem:[#allocation8 + $0x198] sm:$0xff] }
 0x134   :  { %2365 = vmatpush1.bf16.msra.mxu1 %v2364_v36  ;;  %2171 = vmatprep.subr.bf16.mxu0 %v2170_v37  ;;  %v2386_v36 = vpack.c.bf16 %v1124_v30, %v1120_v29  ;;  %v1119_v37 = vld [vmem:[#allocation8 + $0x40] sm:$0xff]  ;;  %v1166_v29 = vld [vmem:[#allocation8 + $0x1b8] sm:$0xff]  ;;  %v2406_v32 = vpack.c.bf16 %v1164_v27, %v1160_v26 }
 0x135   :  { %2367 = vmatprep.subr.bf16.mxu1 %v2366_v41  ;;  %v1125_v41 = vld [vmem:[#allocation8 + $0x70] sm:$0xff]  ;;  %v2388_v46 = vpack.c.bf16 %v1123_v38, %v1119_v37  ;;  %v1168_v38 = vld [vmem:[#allocation8 + $0x1c8] sm:$0xff] }
 0x136   :  { %v1165_v37 = vld [vmem:[#allocation8 + $0x1b0] sm:$0xff] }
 0x137   :  { %2173 = vmatpush1.bf16.msra.mxu0 %v2172_v47  ;;  %v2516_v47 = vpack.c.bf16 %v1125_v41, %v1121_v39  ;;  %v1172_v39 = vld [vmem:[#allocation8 + $0x1e8] sm:$0xff]  ;;  %v1174_v41 = vld [vmem:[#allocation8 + $0x1f8] sm:$0xff] }
 0x138   :  { %2369 = vmatpush1.bf16.msra.mxu1 %v2368_v48  ;;  %2175 = vmatprep.subr.bf16.mxu0 %v2174_v49  ;;  %v2390_v48 = vpack.c.bf16 %v1132_v43, %v1128_v42  ;;  %v1127_v49 = vld [vmem:[#allocation8 + $0x80] sm:$0xff]  ;;  %v2410_v44 = vpack.c.bf16 %v1172_v39, %v1168_v38 }
 0x139   :  { %2371 = vmatprep.subr.bf16.mxu1 %v2370_v53  ;;  %v1133_v53 = vld [vmem:[#allocation8 + $0xb0] sm:$0xff]  ;;  %v2392_v58 = vpack.c.bf16 %v1131_v50, %v1127_v49  ;;  %v1176_v50 = vld [vmem:[#allocation8 + $0x208] sm:$0xff] }
 0x13a   :  { %v1173_v49 = vld [vmem:[#allocation8 + $0x1f0] sm:$0xff] }
 0x13b   :  { %2177 = vmatpush1.bf16.msra.mxu0 %v2176_v59  ;;  %v2520_v59 = vpack.c.bf16 %v1133_v53, %v1129_v51  ;;  %v1180_v51 = vld [vmem:[#allocation8 + $0x228] sm:$0xff]  ;;  %v1182_v53 = vld [vmem:[#allocation8 + $0x238] sm:$0xff] }
 0x13c   :  { %2373 = vmatpush1.bf16.msra.mxu1 %v2372_v60  ;;  %2179 = vmatprep.subr.bf16.mxu0 %v2178_v61  ;;  %v2394_v60 = vpack.c.bf16 %v1140_v55, %v1136_v54  ;;  %v1135_v61 = vld [vmem:[#allocation8 + $0xc0] sm:$0xff]  ;;  %v2414_v56 = vpack.c.bf16 %v1180_v51, %v1176_v50 }
 0x13d   :  { %2375 = vmatprep.subr.bf16.mxu1 %v2374_v1  ;;  %v1141_v1 = vld [vmem:[#allocation8 + $0xf0] sm:$0xff]  ;;  %v2396_v6 = vpack.c.bf16 %v1139_v62, %v1135_v61  ;;  %v1184_v62 = vld [vmem:[#allocation8 + $0x248] sm:$0xff] }
 0x13e   :  { %v1181_v61 = vld [vmem:[#allocation8 + $0x230] sm:$0xff] }
 0x13f   :  { %2181 = vmatpush1.bf16.msra.mxu0 %v2180_v7  ;;  %v2524_v7 = vpack.c.bf16 %v1141_v1, %v1137_v63  ;;  %v1188_v63 = vld [vmem:[#allocation8 + $0x268] sm:$0xff]  ;;  %v1190_v1 = vld [vmem:[#allocation8 + $0x278] sm:$0xff] }
 0x140   :  { %2377 = vmatpush1.bf16.msra.mxu1 %v2376_v8  ;;  %2183 = vmatprep.subr.bf16.mxu0 %v2182_v9  ;;  %v2398_v8 = vpack.c.bf16 %v1148_v3, %v1144_v2  ;;  %v1143_v9 = vld [vmem:[#allocation8 + $0x100] sm:$0xff] }
 0x141   :  { %2379 = vmatprep.subr.bf16.mxu1 %v2378_v12  ;;  %v2526_v12 = vpack.c.bf16 %v1150_v5, %v1146_v4  ;;  %v2418_v4 = vpack.c.bf16 %v1188_v63, %v1184_v62  ;;  %v1183_v5 = vld [vmem:[#allocation8 + $0x240] sm:$0xff] }
 0x142   :  { %746 = vmatmul.mubr.f32.vlgmr.msra.gmra.mrb[0].mxu0 %v118_v17 }
 0x143   :  { %1030 = vmatmul.mubr.f32.vlgmr.msra.gmra.mrb[0].mxu1 %v118_v17  ;;  %2185 = vmatpush1.bf16.msra.mxu0 %v2184_v18  ;;  %v1158_v17 = vld [vmem:[#allocation8 + $0x178] sm:$0xff]  ;;  %v2400_v18 = vpack.c.bf16 %v1147_v10, %v1143_v9  ;;  %v1189_v9 = vld [vmem:[#allocation8 + $0x270] sm:$0xff]  ;;  %v1192_v10 = vld [vmem:[#allocation8 + $0x288] sm:$0xff] }
 0x144   :  { %2381 = vmatpush1.bf16.msra.mxu1 %v2380_v21  ;;  %816 = vmatprep.mubr.f32.mxu0 %v2940_v24  ;;  %v1151_v21 = vld [vmem:[#allocation8 + $0x140] sm:$0xff] }
 0x145   :  { %1100 = vmatprep.mubr.f32.mxu1 %v2940_v24  ;;  %2383 = vmatprep.subr.bf16.mxu0 %v2382_v22  ;;  %v1155_v22 = vld [vmem:[#allocation8 + $0x160] sm:$0xff]  ;;  %v2530_v24 = vpack.c.bf16 %v1158_v17, %v1154_v16  ;;  %v2422_v16 = vpack.c.bf16 %v1196_v11, %v1192_v10  ;;  %v1234_v10 = vld [vmem:[#allocation8 + $0x3d8] sm:$0xff] }
 0x146   :  { %2511 = vmatprep.subr.bf16.mxu1 %v2510_v23  ;;  %v1153_v23 = vld [vmem:[#allocation8 + $0x150] sm:$0xff]  ;;  %v2404_v30 = vpack.c.bf16 %v1155_v22, %v1151_v21  ;;  %v1191_v17 = vld [vmem:[#allocation8 + $0x280] sm:$0xff]  ;;  %v1200_v22 = vld [vmem:[#allocation8 + $0x2c8] sm:$0xff] }
 0x147   :  { %v2532_v31 = vpack.c.bf16 %v1157_v25, %v1153_v23  ;;  %v1197_v21 = vld [vmem:[#allocation8 + $0x2b0] sm:$0xff]  ;;  %v1204_v23 = vld [vmem:[#allocation8 + $0x2e8] sm:$0xff]  ;;  %v1206_v25 = vld [vmem:[#allocation8 + $0x2f8] sm:$0xff] }
 0x14a   :  { %1917 = vmatmul.mubr.msk.f32.vlgmr.msra.gmra.mrb[0].mxu0 %vm535_vm0, %v120_v33 }
 0x14b   :  { %1918 = vmatmul.mubr.msk.f32.vlgmr.msra.gmra.mrb[0].mxu1 %vm535_vm0, %v120_v33  ;;  %2385 = vmatpush1.bf16.msra.mxu0 %v2384_v34  ;;  %v1159_v33 = vld [vmem:[#allocation8 + $0x180] sm:$0xff] }
 0x14c   :  { %2513 = vmatpush1.bf16.msra.mxu1 %v2512_v35  ;;  %2387 = vmatprep.subr.bf16.mxu0 %v2386_v36  ;;  %v1163_v34 = vld [vmem:[#allocation8 + $0x1a0] sm:$0xff]  ;;  %v1161_v35 = vld [vmem:[#allocation8 + $0x190] sm:$0xff]  ;;  %v2534_v36 = vpack.c.bf16 %v1166_v29, %v1162_v28  ;;  %v2426_v28 = vpack.c.bf16 %v1204_v23, %v1200_v22  ;;  %v1242_v22 = vld [vmem:[#allocation8 + $0x418] sm:$0xff] }
 0x14d   :  { %2515 = vmatprep.subr.bf16.mxu1 %v2514_v40  ;;  %v1170_v40 = vld [vmem:[#allocation8 + $0x1d8] sm:$0xff]  ;;  %v2408_v42 = vpack.c.bf16 %v1163_v34, %v1159_v33  ;;  %v2536_v43 = vpack.c.bf16 %v1165_v37, %v1161_v35  ;;  %v1199_v29 = vld [vmem:[#allocation8 + $0x2c0] sm:$0xff]  ;;  %v1205_v33 = vld [vmem:[#allocation8 + $0x2f0] sm:$0xff] }
 0x14e   :  { %v1208_v34 = vld [vmem:[#allocation8 + $0x308] sm:$0xff]  ;;  %v1214_v37 = vld [vmem:[#allocation8 + $0x338] sm:$0xff] }
 0x14f   :  { %2389 = vmatpush1.bf16.msra.mxu0 %v2388_v46  ;;  %v1171_v46 = vld [vmem:[#allocation8 + $0x1e0] sm:$0xff]  ;;  %v1212_v35 = vld [vmem:[#allocation8 + $0x328] sm:$0xff] }
 0x150   :  { %2517 = vmatpush1.bf16.msra.mxu1 %v2516_v47  ;;  %2391 = vmatprep.subr.bf16.mxu0 %v2390_v48  ;;  %v1169_v47 = vld [vmem:[#allocation8 + $0x1d0] sm:$0xff]  ;;  %v2538_v48 = vpack.c.bf16 %v1174_v41, %v1170_v40  ;;  %v2412_v54 = vpack.c.bf16 %v1171_v46, %v1167_v45  ;;  %v2430_v40 = vpack.c.bf16 %v1212_v35, %v1208_v34  ;;  %v1207_v41 = vld [vmem:[#allocation8 + $0x300] sm:$0xff]  ;;  %v1216_v46 = vld [vmem:[#allocation8 + $0x348] sm:$0xff] }
 0x151   :  { %2519 = vmatprep.subr.bf16.mxu1 %v2518_v52  ;;  %v1178_v52 = vld [vmem:[#allocation8 + $0x218] sm:$0xff]  ;;  %v2540_v55 = vpack.c.bf16 %v1173_v49, %v1169_v47  ;;  %v1213_v45 = vld [vmem:[#allocation8 + $0x330] sm:$0xff]  ;;  %v1220_v47 = vld [vmem:[#allocation8 + $0x368] sm:$0xff] }
 0x152   :  { %v1222_v49 = vld [vmem:[#allocation8 + $0x378] sm:$0xff] }
 0x153   :  { %2393 = vmatpush1.bf16.msra.mxu0 %v2392_v58  ;;  %v1179_v58 = vld [vmem:[#allocation8 + $0x220] sm:$0xff] }
 0x154   :  { %2521 = vmatpush1.bf16.msra.mxu1 %v2520_v59  ;;  %2395 = vmatprep.subr.bf16.mxu0 %v2394_v60  ;;  %v1177_v59 = vld [vmem:[#allocation8 + $0x210] sm:$0xff]  ;;  %v2542_v60 = vpack.c.bf16 %v1182_v53, %v1178_v52  ;;  %v2416_v2 = vpack.c.bf16 %v1179_v58, %v1175_v57  ;;  %v2434_v52 = vpack.c.bf16 %v1220_v47, %v1216_v46  ;;  %v1215_v53 = vld [vmem:[#allocation8 + $0x340] sm:$0xff]  ;;  %v1224_v58 = vld [vmem:[#allocation8 + $0x388] sm:$0xff] }
 0x155   :  { %2523 = vmatprep.subr.bf16.mxu1 %v2522_v0  ;;  %v1186_v0 = vld [vmem:[#allocation8 + $0x258] sm:$0xff]  ;;  %v2544_v3 = vpack.c.bf16 %v1181_v61, %v1177_v59  ;;  %v1221_v57 = vld [vmem:[#allocation8 + $0x370] sm:$0xff]  ;;  %v1228_v59 = vld [vmem:[#allocation8 + $0x3a8] sm:$0xff] }
 0x156   :  { %v1230_v61 = vld [vmem:[#allocation8 + $0x3b8] sm:$0xff]  ;;  %v1252_v47 = vld [vmem:[#allocation8 + $0x468] sm:$0xff] }
 0x157   :  { %2397 = vmatpush1.bf16.msra.mxu0 %v2396_v6  ;;  %v1187_v6 = vld [vmem:[#allocation8 + $0x260] sm:$0xff] }
 0x158   :  { %2525 = vmatpush1.bf16.msra.mxu1 %v2524_v7  ;;  %2399 = vmatprep.subr.bf16.mxu0 %v2398_v8  ;;  %v1185_v7 = vld [vmem:[#allocation8 + $0x250] sm:$0xff]  ;;  %v2546_v8 = vpack.c.bf16 %v1190_v1, %v1186_v0  ;;  %v2420_v14 = vpack.c.bf16 %v1187_v6, %v1183_v5  ;;  %v2438_v0 = vpack.c.bf16 %v1228_v59, %v1224_v58  ;;  %v1223_v1 = vld [vmem:[#allocation8 + $0x380] sm:$0xff]  ;;  %v1256_v58 = vld [vmem:[#allocation8 + $0x488] sm:$0xff] }
 0x159   :  { %2527 = vmatprep.subr.bf16.mxu1 %v2526_v12  ;;  %v1194_v12 = vld [vmem:[#allocation8 + $0x298] sm:$0xff]  ;;  %v2548_v15 = vpack.c.bf16 %v1189_v9, %v1185_v7  ;;  %v1229_v5 = vld [vmem:[#allocation8 + $0x3b0] sm:$0xff]  ;;  %v1236_v9 = vld [vmem:[#allocation8 + $0x3e8] sm:$0xff] }
 0x15b   :  { %2401 = vmatpush1.bf16.msra.mxu0 %v2400_v18  ;;  %v1195_v18 = vld [vmem:[#allocation8 + $0x2a0] sm:$0xff] }
 0x15c   :  { %2529 = vmatpush1.bf16.msra.mxu1 %v2528_v19  ;;  %2403 = vmatprep.subr.bf16.mxu0 %v2402_v20  ;;  %v1193_v19 = vld [vmem:[#allocation8 + $0x290] sm:$0xff]  ;;  %v2550_v20 = vpack.c.bf16 %v1198_v13, %v1194_v12  ;;  %v2424_v26 = vpack.c.bf16 %v1195_v18, %v1191_v17  ;;  %v1238_v12 = vld [vmem:[#allocation8 + $0x3f8] sm:$0xff]  ;;  %v1231_v13 = vld [vmem:[#allocation8 + $0x3c0] sm:$0xff] }
 0x15d   :  { %2531 = vmatprep.subr.bf16.mxu1 %v2530_v24  ;;  %v1202_v24 = vld [vmem:[#allocation8 + $0x2d8] sm:$0xff]  ;;  %v2552_v27 = vpack.c.bf16 %v1197_v21, %v1193_v19  ;;  %v1233_v17 = vld [vmem:[#allocation8 + $0x3d0] sm:$0xff]  ;;  %v1244_v21 = vld [vmem:[#allocation8 + $0x428] sm:$0xff] }
 0x15e   :  { %v1237_v18 = vld [vmem:[#allocation8 + $0x3f0] sm:$0xff] }
 0x15f   :  { %2405 = vmatpush1.bf16.msra.mxu0 %v2404_v30  ;;  %v1203_v30 = vld [vmem:[#allocation8 + $0x2e0] sm:$0xff]  ;;  %v2572_v19 = vpack.c.bf16 %v1237_v18, %v1233_v17 }
 0x160   :  { %2533 = vmatpush1.bf16.msra.mxu1 %v2532_v31  ;;  %2407 = vmatprep.subr.bf16.mxu0 %v2406_v32  ;;  %v1201_v31 = vld [vmem:[#allocation8 + $0x2d0] sm:$0xff]  ;;  %v2554_v32 = vpack.c.bf16 %v1206_v25, %v1202_v24  ;;  %v2428_v38 = vpack.c.bf16 %v1203_v30, %v1199_v29  ;;  %v1246_v24 = vld [vmem:[#allocation8 + $0x438] sm:$0xff] }
 0x161   :  { %2535 = vmatprep.subr.bf16.mxu1 %v2534_v36  ;;  %v1210_v36 = vld [vmem:[#allocation8 + $0x318] sm:$0xff]  ;;  %v2556_v39 = vpack.c.bf16 %v1205_v33, %v1201_v31  ;;  %v2574_v25 = vpack.c.bf16 %v1246_v24, %v1242_v22  ;;  %v1276_v22 = vld [vmem:[#allocation8 + $0x528] sm:$0xff] }
 0x162   :  { %v3069_v29 = vld [vmem:[#allocation7] sm:$0xf] }
 0x163   :  { %2409 = vmatpush1.bf16.msra.mxu0 %v2408_v42  ;;  %v1211_v42 = vld [vmem:[#allocation8 + $0x320] sm:$0xff]  ;;  %v1278_v24 = vld [vmem:[#allocation8 + $0x538] sm:$0xff] }
 0x164   :  { %2537 = vmatpush1.bf16.msra.mxu1 %v2536_v43  ;;  %2411 = vmatprep.subr.bf16.mxu0 %v2410_v44  ;;  %v1209_v43 = vld [vmem:[#allocation8 + $0x310] sm:$0xff]  ;;  %v2558_v44 = vpack.c.bf16 %v1214_v37, %v1210_v36  ;;  %v2432_v50 = vpack.c.bf16 %v1211_v42, %v1207_v41  ;;  %v1239_v36 = vld [vmem:[#allocation8 + $0x400] sm:$0xff] }
 0x165   :  { %2539 = vmatprep.subr.bf16.mxu1 %v2538_v48  ;;  %v1218_v48 = vld [vmem:[#allocation8 + $0x358] sm:$0xff]  ;;  %v2560_v51 = vpack.c.bf16 %v1213_v45, %v1209_v43  ;;  %v1241_v41 = vld [vmem:[#allocation8 + $0x410] sm:$0xff]  ;;  %v1248_v45 = vld [vmem:[#allocation8 + $0x448] sm:$0xff] }
 0x166   :  { %v1245_v42 = vld [vmem:[#allocation8 + $0x430] sm:$0xff]  ;;  %v2450_v59 = vpack.c.bf16 %v1252_v47, %v1248_v45  ;;  %v1279_v45 = vld [vmem:[#allocation8 + $0x540] sm:$0xff] }
 0x167   :  { %2413 = vmatpush1.bf16.msra.mxu0 %v2412_v54  ;;  %v1219_v54 = vld [vmem:[#allocation8 + $0x360] sm:$0xff] }
 0x168   :  { %2541 = vmatpush1.bf16.msra.mxu1 %v2540_v55  ;;  %2415 = vmatprep.subr.bf16.mxu0 %v2414_v56  ;;  %v1217_v55 = vld [vmem:[#allocation8 + $0x350] sm:$0xff]  ;;  %v2562_v56 = vpack.c.bf16 %v1222_v49, %v1218_v48  ;;  %v2436_v62 = vpack.c.bf16 %v1219_v54, %v1215_v53  ;;  %v1250_v48 = vld [vmem:[#allocation8 + $0x458] sm:$0xff]  ;;  %v1247_v53 = vld [vmem:[#allocation8 + $0x440] sm:$0xff] }
 0x169   :  { %2543 = vmatprep.subr.bf16.mxu1 %v2542_v60  ;;  %v1226_v60 = vld [vmem:[#allocation8 + $0x398] sm:$0xff]  ;;  %v2564_v63 = vpack.c.bf16 %v1221_v57, %v1217_v55  ;;  %v1251_v54 = vld [vmem:[#allocation8 + $0x460] sm:$0xff]  ;;  %v1253_v57 = vld [vmem:[#allocation8 + $0x470] sm:$0xff] }
 0x16a   :  { %v1254_v49 = vld [vmem:[#allocation8 + $0x478] sm:$0xff] }
 0x16b   :  { %2417 = vmatpush1.bf16.msra.mxu0 %v2416_v2  ;;  %v1227_v2 = vld [vmem:[#allocation8 + $0x3a0] sm:$0xff] }
 0x16c   :  { %2545 = vmatpush1.bf16.msra.mxu1 %v2544_v3  ;;  %2419 = vmatprep.subr.bf16.mxu0 %v2418_v4  ;;  %v2566_v3 = vpack.c.bf16 %v1230_v61, %v1226_v60  ;;  %v1225_v4 = vld [vmem:[#allocation8 + $0x390] sm:$0xff]  ;;  %v2440_v6 = vpack.c.bf16 %v1227_v2, %v1223_v1  ;;  %v2578_v60 = vpack.c.bf16 %v1254_v49, %v1250_v48  ;;  %v1260_v61 = vld [vmem:[#allocation8 + $0x4a8] sm:$0xff] }
 0x16d   :  { %2547 = vmatprep.subr.bf16.mxu1 %v2546_v8  ;;  %v2568_v7 = vpack.c.bf16 %v1229_v5, %v1225_v4  ;;  %v1232_v8 = vld [vmem:[#allocation8 + $0x3c8] sm:$0xff]  ;;  %v2452_v1 = vpack.c.bf16 %v1251_v54, %v1247_v53  ;;  %v1259_v4 = vld [vmem:[#allocation8 + $0x4a0] sm:$0xff]  ;;  %v2454_v5 = vpack.c.bf16 %v1260_v61, %v1256_v58  ;;  %v1281_v49 = vld [vmem:[#allocation8 + $0x550] sm:$0xff] }
 0x16e   :  { %v2442_v11 = vpack.c.bf16 %v1236_v9, %v1232_v8  ;;  %v1261_v8 = vld [vmem:[#allocation8 + $0x4b0] sm:$0xff]  ;;  %v1264_v9 = vld [vmem:[#allocation8 + $0x4c8] sm:$0xff]  ;;  %v1290_v53 = vld [vmem:[#allocation8 + $0x598] sm:$0xff] }
 0x16f   :  { %2421 = vmatpush1.bf16.msra.mxu0 %v2420_v14  ;;  %v1235_v14 = vld [vmem:[#allocation8 + $0x3e0] sm:$0xff]  ;;  %v1294_v54 = vld [vmem:[#allocation8 + $0x5b8] sm:$0xff]  ;;  %v1289_v61 = vld [vmem:[#allocation8 + $0x590] sm:$0xff] }
 0x170   :  { %2549 = vmatpush1.bf16.msra.mxu1 %v2548_v15  ;;  %2423 = vmatprep.subr.bf16.mxu0 %v2422_v16  ;;  %v2570_v15 = vpack.c.bf16 %v1238_v12, %v1234_v10  ;;  %v2444_v16 = vpack.c.bf16 %v1235_v14, %v1231_v13  ;;  %v1268_v10 = vld [vmem:[#allocation8 + $0x4e8] sm:$0xff]  ;;  %v1270_v12 = vld [vmem:[#allocation8 + $0x4f8] sm:$0xff]  ;;  %v1291_v58 = vld [vmem:[#allocation8 + $0x5a0] sm:$0xff] }
 0x171   :  { %2551 = vmatprep.subr.bf16.mxu1 %v2550_v20  ;;  %v1240_v20 = vld [vmem:[#allocation8 + $0x408] sm:$0xff]  ;;  %v2458_v17 = vpack.c.bf16 %v1268_v10, %v1264_v9  ;;  %v1297_v9 = vld [vmem:[#allocation8 + $0x5d0] sm:$0xff] }
 0x172   :  { %v2446_v23 = vpack.c.bf16 %v1244_v21, %v1240_v20  ;;  %v1269_v20 = vld [vmem:[#allocation8 + $0x4f0] sm:$0xff]  ;;  %v1272_v21 = vld [vmem:[#allocation8 + $0x508] sm:$0xff] }
 0x173   :  { %2425 = vmatpush1.bf16.msra.mxu0 %v2424_v26  ;;  %v515_v26 = vlaneseq  ;;  %v1301_v10 = vld [vmem:[#allocation8 + $0x5f0] sm:$0xff] }
 0x174   :  { %2553 = vmatpush1.bf16.msra.mxu1 %v2552_v27  ;;  %2427 = vmatprep.subr.bf16.mxu0 %v2426_v28 }
 0x175   :  { %2555 = vmatprep.subr.bf16.mxu1 %v2554_v32  ;;  %v3066_v27 = vshrl.u32 %v515_v26, 7 }
 0x177   :  { %2429 = vmatpush1.bf16.msra.mxu0 %v2428_v38  ;;  %v517_v28 = vsub.s32 0, %v3066_v27  ;;  %v521_v30 = vsub.s32 1, %v3066_v27  ;;  %v529_v31 = vsub.s32 3, %v3066_v27 }
 0x178   :  { %2557 = vmatpush1.bf16.msra.mxu1 %v2556_v39  ;;  %2431 = vmatprep.subr.bf16.mxu0 %v2430_v40  ;;  %v1243_v40 = vld [vmem:[#allocation8 + $0x420] sm:$0xff] }
 0x179   :  { %2559 = vmatprep.subr.bf16.mxu1 %v2558_v44  ;;  %v518_v32 = vrot.slane %v3069_v29, %v517_v28  ;;  %v522_v33 = vrot.slane %v3069_v29, %v521_v30  ;;  %v530_v34 = vrot.slane %v3069_v29, %v529_v31 }
 0x17b   :  { %2433 = vmatpush1.bf16.msra.mxu0 %v2432_v50 }
 0x17c   :  { %2561 = vmatpush1.bf16.msra.mxu1 %v2560_v51  ;;  %2435 = vmatprep.subr.bf16.mxu0 %v2434_v52  ;;  %v2448_v51 = vpack.c.bf16 %v1243_v40, %v1239_v36  ;;  %v2576_v52 = vpack.c.bf16 %v1245_v42, %v1241_v41  ;;  %v1273_v36 = vld [vmem:[#allocation8 + $0x510] sm:$0xff]  ;;  %v1284_v40 = vld [vmem:[#allocation8 + $0x568] sm:$0xff]  ;;  %v1282_v41 = vld [vmem:[#allocation8 + $0x558] sm:$0xff] }
 0x17d   :  { %2563 = vmatprep.subr.bf16.mxu1 %v2562_v56  ;;  %v1249_v56 = vld [vmem:[#allocation8 + $0x450] sm:$0xff]  ;;  %v1286_v42 = vld [vmem:[#allocation8 + $0x578] sm:$0xff] }
 0x17e   :  { %v2580_v2 = vpack.c.bf16 %v1253_v57, %v1249_v56  ;;  %v2594_v48 = vpack.c.bf16 %v1286_v42, %v1282_v41  ;;  %v1287_v57 = vld [vmem:[#allocation8 + $0x580] sm:$0xff]  ;;  %v1320_v41 = vld [vmem:[#allocation8 + $0x688] sm:$0xff] }
 0x17f   :  { %2437 = vmatpush1.bf16.msra.mxu0 %v2436_v62  ;;  %v1258_v62 = vld [vmem:[#allocation8 + $0x498] sm:$0xff]  ;;  %v1324_v42 = vld [vmem:[#allocation8 + $0x6a8] sm:$0xff] }
 0x180   :  { %2565 = vmatpush1.bf16.msra.mxu1 %v2564_v63  ;;  %2439 = vmatprep.subr.bf16.mxu0 %v2438_v0  ;;  %v1262_v63 = vld [vmem:[#allocation8 + $0x4b8] sm:$0xff] }
 0x181   :  { %2567 = vmatprep.subr.bf16.mxu1 %v2566_v3  ;;  %v1255_v3 = vld [vmem:[#allocation8 + $0x480] sm:$0xff] }
 0x182   :  { %v2456_v13 = vpack.c.bf16 %v1259_v4, %v1255_v3  ;;  %v2472_v3 = vpack.c.bf16 %v1291_v58, %v1287_v57 }
 0x183   :  { %2441 = vmatpush1.bf16.msra.mxu0 %v2440_v6  ;;  %v2582_v6 = vpack.c.bf16 %v1262_v63, %v1258_v62  ;;  %v1293_v62 = vld [vmem:[#allocation8 + $0x5b0] sm:$0xff]  ;;  %v1296_v63 = vld [vmem:[#allocation8 + $0x5c8] sm:$0xff] }
 0x184   :  { %2569 = vmatpush1.bf16.msra.mxu1 %v2568_v7  ;;  %2443 = vmatprep.subr.bf16.mxu0 %v2442_v11  ;;  %v1257_v7 = vld [vmem:[#allocation8 + $0x490] sm:$0xff]  ;;  %v1266_v11 = vld [vmem:[#allocation8 + $0x4d8] sm:$0xff]  ;;  %v2600_v4 = vpack.c.bf16 %v1293_v62, %v1289_v61 }
 0x185   :  { %2571 = vmatprep.subr.bf16.mxu1 %v2570_v15  ;;  %v2584_v14 = vpack.c.bf16 %v1261_v8, %v1257_v7  ;;  %v1263_v15 = vld [vmem:[#allocation8 + $0x4c0] sm:$0xff]  ;;  %v2586_v18 = vpack.c.bf16 %v1270_v12, %v1266_v11  ;;  %v1304_v11 = vld [vmem:[#allocation8 + $0x608] sm:$0xff] }
 0x186   :  { %v1308_v12 = vld [vmem:[#allocation8 + $0x628] sm:$0xff] }
 0x187   :  { %2445 = vmatpush1.bf16.msra.mxu0 %v2444_v16  ;;  %v1267_v16 = vld [vmem:[#allocation8 + $0x4e0] sm:$0xff] }
 0x188   :  { %2573 = vmatpush1.bf16.msra.mxu1 %v2572_v19  ;;  %2447 = vmatprep.subr.bf16.mxu0 %v2446_v23  ;;  %v1265_v19 = vld [vmem:[#allocation8 + $0x4d0] sm:$0xff]  ;;  %v1274_v23 = vld [vmem:[#allocation8 + $0x518] sm:$0xff] }
 0x189   :  { %2575 = vmatprep.subr.bf16.mxu1 %v2574_v25  ;;  %v2460_v25 = vpack.c.bf16 %v1267_v16, %v1263_v15  ;;  %v2588_v26 = vpack.c.bf16 %v1269_v20, %v1265_v19  ;;  %v2604_v16 = vpack.c.bf16 %v1301_v10, %v1297_v9  ;;  %v2478_v19 = vpack.c.bf16 %v1308_v12, %v1304_v11  ;;  %v1337_v11 = vld [vmem:[#allocation8 + $0x710] sm:$0xff] }
 0x18a   :  { %v1341_v12 = vld [vmem:[#allocation8 + $0x730] sm:$0xff] }
 0x21d   :  { %v818_v35 = vpop.f32.mrb[0].mxu0 }
 0x21e   :  { %v2702_v37 = vadd.f32 %v818_v35, %v518_v32  ;;  %v3082_v38 = vpop.f32.mrb[0].mxu1  ;;  %v820_v39 = vpop.f32.mrb[1].mxu0  ;;  %v1271_v32 = vld [vmem:[#allocation8 + $0x500] sm:$0xff]  ;;  %v2590_v35 = vpack.c.bf16 %v1278_v24, %v1274_v23  ;;  %v1312_v23 = vld [vmem:[#allocation8 + $0x648] sm:$0xff] }
 0x21f   :  { %v2703_v43 = vadd.f32 %v820_v39, %v522_v33  ;;  %v1104_v44 = vpop.f32.mrb[1].mxu1  ;;  %v1275_v33 = vld [vmem:[#allocation8 + $0x520] sm:$0xff]  ;;  %v1280_v39 = vld [vmem:[#allocation8 + $0x548] sm:$0xff] }
 0x220   :  { %v2705_v46 = vadd.f32 %v1104_v44, %v530_v34  ;;  %v1107_v55 = vmax.f32 %v2702_v37, 0.0  ;;  %v2462_v34 = vpack.c.bf16 %v1276_v22, %v1272_v21  ;;  %v1277_v37 = vld [vmem:[#allocation8 + $0x530] sm:$0xff]  ;;  %v2466_v47 = vpack.c.bf16 %v1284_v40, %v1280_v39  ;;  %v1316_v24 = vld [vmem:[#allocation8 + $0x668] sm:$0xff] }
 0x221   :  { %v1108_v50 = vmax.f32 %v2703_v43, 0.0  ;;  %v2464_v43 = vpack.c.bf16 %v1275_v33, %v1271_v32  ;;  %v2592_v44 = vpack.c.bf16 %v1277_v37, %v1273_v36  ;;  %v1305_v21 = vld [vmem:[#allocation8 + $0x610] sm:$0xff]  ;;  %v2482_v36 = vpack.c.bf16 %v1316_v24, %v1312_v23 }
 0x222   :  { %v1110_v0 = vmax.f32 %v2705_v46, 0.0  ;;  %v1283_v46 = vld [vmem:[#allocation8 + $0x560] sm:$0xff]  ;;  %v1309_v22 = vld [vmem:[#allocation8 + $0x630] sm:$0xff] }
 0x223   :  { %1453 = vmatprep.mubr.f32.mxu0 %v1108_v50  ;;  %1595 = vmatprep.mubr.f32.mxu1 %v1108_v50  ;;  %v1285_v50 = vld [vmem:[#allocation8 + $0x570] sm:$0xff]  ;;  %v2608_v33 = vpack.c.bf16 %v1309_v22, %v1305_v21 }
 0x224   :  { %1454 = vmatmul.mubr.f32.vlgmr.msra.gmra.mrb[2].mxu0 %v1107_v55  ;;  %1596 = vmatmul.mubr.f32.vlgmr.msra.gmra.mrb[2].mxu1 %v1107_v55  ;;  %v2468_v55 = vpack.c.bf16 %v1283_v46, %v1279_v45  ;;  %v2596_v56 = vpack.c.bf16 %v1285_v50, %v1281_v49  ;;  %v1313_v39 = vld [vmem:[#allocation8 + $0x650] sm:$0xff]  ;;  %v2486_v49 = vpack.c.bf16 %v1324_v42, %v1320_v41 }
 0x225   :  { %2449 = vmatpush1.bf16.msra.mxu0 %v2448_v51  ;;  %2577 = vmatpush1.bf16.msra.mxu1 %v2576_v52  ;;  %v1288_v51 = vld [vmem:[#allocation8 + $0x588] sm:$0xff]  ;;  %v1317_v40 = vld [vmem:[#allocation8 + $0x670] sm:$0xff] }
 0x226   :  { %1524 = vmatprep.mubr.f32.mxu0 %v1110_v0  ;;  %1666 = vmatprep.mubr.f32.mxu1 %v1110_v0  ;;  %v1292_v52 = vld [vmem:[#allocation8 + $0x5a8] sm:$0xff]  ;;  %v2612_v46 = vpack.c.bf16 %v1317_v40, %v1313_v39  ;;  %v1345_v23 = vld [vmem:[#allocation8 + $0x750] sm:$0xff]  ;;  %v525_v39 = vsub.s32 2, %v3066_v27  ;;  %v1919_v27 = vld [vmem:[#allocation13] ss:$0 sm:$0xff] }
 0x227   :  { %2451 = vmatprep.subr.bf16.mxu0 %v2450_v59  ;;  %2579 = vmatprep.subr.bf16.mxu1 %v2578_v60  ;;  %v2470_v59 = vpack.c.bf16 %v1292_v52, %v1288_v51  ;;  %v2598_v60 = vpack.c.bf16 %v1294_v54, %v1290_v53  ;;  %v1300_v0 = vld [vmem:[#allocation8 + $0x5e8] sm:$0xff]  ;;  %v1321_v51 = vld [vmem:[#allocation8 + $0x690] sm:$0xff] }
 0x228   :  { %v2474_v7 = vpack.c.bf16 %v1300_v0, %v1296_v63  ;;  %v1325_v52 = vld [vmem:[#allocation8 + $0x6b0] sm:$0xff]  ;;  %v1328_v53 = vld [vmem:[#allocation8 + $0x6c8] sm:$0xff] }
 0x229   :  { %2453 = vmatpush1.bf16.msra.mxu0 %v2452_v1  ;;  %2581 = vmatpush1.bf16.msra.mxu1 %v2580_v2  ;;  %v1298_v1 = vld [vmem:[#allocation8 + $0x5d8] sm:$0xff]  ;;  %v1332_v54 = vld [vmem:[#allocation8 + $0x6e8] sm:$0xff]  ;;  %v2616_v58 = vpack.c.bf16 %v1325_v52, %v1321_v51  ;;  %v1329_v63 = vld [vmem:[#allocation8 + $0x6d0] sm:$0xff]  ;;  %v526_v52 = vrot.slane %v3069_v29, %v525_v39 }
 0x22a   :  { %2455 = vmatprep.subr.bf16.mxu0 %v2454_v5  ;;  %2583 = vmatprep.subr.bf16.mxu1 %v2582_v6  ;;  %v1302_v2 = vld [vmem:[#allocation8 + $0x5f8] sm:$0xff]  ;;  %v1295_v5 = vld [vmem:[#allocation8 + $0x5c0] sm:$0xff]  ;;  %v2490_v61 = vpack.c.bf16 %v1332_v54, %v1328_v53  ;;  %v1333_v0 = vld [vmem:[#allocation8 + $0x6f0] sm:$0xff] }
 0x22b   :  { %v1299_v6 = vld [vmem:[#allocation8 + $0x5e0] sm:$0xff]  ;;  %v2602_v8 = vpack.c.bf16 %v1302_v2, %v1298_v1  ;;  %v1336_v1 = vld [vmem:[#allocation8 + $0x708] sm:$0xff]  ;;  %v1349_v24 = vld [vmem:[#allocation8 + $0x770] sm:$0xff] }
 0x22c   :  { %v2476_v15 = vpack.c.bf16 %v1299_v6, %v1295_v5  ;;  %v1340_v2 = vld [vmem:[#allocation8 + $0x728] sm:$0xff]  ;;  %v2620_v6 = vpack.c.bf16 %v1333_v0, %v1329_v63  ;;  %v1353_v42 = vld [vmem:[#allocation8 + $0x790] sm:$0xff]  ;;  %v1363_v51 = vld [vmem:[#allocation8 + $0x7e0] sm:$0xff] }
 0x22d   :  { %2457 = vmatpush1.bf16.msra.mxu0 %v2456_v13  ;;  %2585 = vmatpush1.bf16.msra.mxu1 %v2584_v14  ;;  %v1306_v13 = vld [vmem:[#allocation8 + $0x618] sm:$0xff]  ;;  %v2494_v9 = vpack.c.bf16 %v1340_v2, %v1336_v1  ;;  %v1677_v63 = vld [vmem:[#allocation11] sm:$0xff]  ;;  %v1678_v0 = vld [vmem:[#allocation11 + $0x8] sm:$0xff]  ;;  %v2704_v1 = vadd.f32 %v3082_v38, %v526_v52 }
 0x22e   :  { %2459 = vmatprep.subr.bf16.mxu0 %v2458_v17  ;;  %2587 = vmatprep.subr.bf16.mxu1 %v2586_v18  ;;  %v1310_v14 = vld [vmem:[#allocation8 + $0x638] sm:$0xff]  ;;  %v1303_v17 = vld [vmem:[#allocation8 + $0x600] sm:$0xff] }
 0x22f   :  { %v1307_v18 = vld [vmem:[#allocation8 + $0x620] sm:$0xff]  ;;  %v2606_v20 = vpack.c.bf16 %v1310_v14, %v1306_v13  ;;  %v1344_v13 = vld [vmem:[#allocation8 + $0x748] sm:$0xff] }
 0x230   :  { %v2480_v32 = vpack.c.bf16 %v1307_v18, %v1303_v17  ;;  %v1348_v14 = vld [vmem:[#allocation8 + $0x768] sm:$0xff]  ;;  %v2624_v18 = vpack.c.bf16 %v1341_v12, %v1337_v11  ;;  %v1679_v11 = vld [vmem:[#allocation11 + $0x10] sm:$0xff]  ;;  %v1680_v12 = vld [vmem:[#allocation11 + $0x18] sm:$0xff] }
 0x231   :  { %2461 = vmatpush1.bf16.msra.mxu0 %v2460_v25  ;;  %2589 = vmatpush1.bf16.msra.mxu1 %v2588_v26  ;;  %v1314_v25 = vld [vmem:[#allocation8 + $0x658] sm:$0xff]  ;;  %v2498_v21 = vpack.c.bf16 %v1348_v14, %v1344_v13  ;;  %v1109_v13 = vmax.f32 %v2704_v1, 0.0 }
 0x232   :  { %2463 = vmatprep.subr.bf16.mxu0 %v2462_v34  ;;  %2591 = vmatprep.subr.bf16.mxu1 %v2590_v35  ;;  %v1318_v26 = vld [vmem:[#allocation8 + $0x678] sm:$0xff]  ;;  %v1311_v34 = vld [vmem:[#allocation8 + $0x640] sm:$0xff] }
 0x233   :  { %v1315_v35 = vld [vmem:[#allocation8 + $0x660] sm:$0xff]  ;;  %v2610_v37 = vpack.c.bf16 %v1318_v26, %v1314_v25  ;;  %v1352_v25 = vld [vmem:[#allocation8 + $0x788] sm:$0xff] }
 0x234   :  { %v2484_v45 = vpack.c.bf16 %v1315_v35, %v1311_v34  ;;  %v1356_v26 = vld [vmem:[#allocation8 + $0x7a8] sm:$0xff]  ;;  %v2628_v35 = vpack.c.bf16 %v1349_v24, %v1345_v23 }
 0x235   :  { %2465 = vmatpush1.bf16.msra.mxu0 %v2464_v43  ;;  %2593 = vmatpush1.bf16.msra.mxu1 %v2592_v44  ;;  %v1322_v43 = vld [vmem:[#allocation8 + $0x698] sm:$0xff]  ;;  %v2502_v40 = vpack.c.bf16 %v1356_v26, %v1352_v25  ;;  %v1681_v23 = vld [vmem:[#allocation11 + $0x20] sm:$0xff]  ;;  %v1682_v24 = vld [vmem:[#allocation11 + $0x28] sm:$0xff] }
 0x236   :  { %2467 = vmatprep.subr.bf16.mxu0 %v2466_v47  ;;  %2595 = vmatprep.subr.bf16.mxu1 %v2594_v48  ;;  %v1326_v44 = vld [vmem:[#allocation8 + $0x6b8] sm:$0xff]  ;;  %v1319_v47 = vld [vmem:[#allocation8 + $0x680] sm:$0xff] }
 0x237   :  { %v1323_v48 = vld [vmem:[#allocation8 + $0x6a0] sm:$0xff]  ;;  %v2614_v50 = vpack.c.bf16 %v1326_v44, %v1322_v43  ;;  %v1357_v43 = vld [vmem:[#allocation8 + $0x7b0] sm:$0xff]  ;;  %v1360_v44 = vld [vmem:[#allocation8 + $0x7c8] sm:$0xff] }
 0x238   :  { %v2488_v57 = vpack.c.bf16 %v1323_v48, %v1319_v47  ;;  %v1366_v47 = vld [vmem:[#allocation8 + $0x7f8] sm:$0xff] }
 0x239   :  { %2469 = vmatpush1.bf16.msra.mxu0 %v2468_v55  ;;  %2597 = vmatpush1.bf16.msra.mxu1 %v2596_v56  ;;  %v1330_v55 = vld [vmem:[#allocation8 + $0x6d8] sm:$0xff] }
 0x23a   :  { %2471 = vmatprep.subr.bf16.mxu0 %v2470_v59  ;;  %2599 = vmatprep.subr.bf16.mxu1 %v2598_v60  ;;  %v1334_v56 = vld [vmem:[#allocation8 + $0x6f8] sm:$0xff]  ;;  %v1327_v59 = vld [vmem:[#allocation8 + $0x6c0] sm:$0xff] }
 0x23b   :  { %v1331_v60 = vld [vmem:[#allocation8 + $0x6e0] sm:$0xff]  ;;  %v2618_v62 = vpack.c.bf16 %v1334_v56, %v1330_v55  ;;  %v1361_v55 = vld [vmem:[#allocation8 + $0x7d0] sm:$0xff] }
 0x23c   :  { %v2492_v5 = vpack.c.bf16 %v1331_v60, %v1327_v59  ;;  %v1365_v56 = vld [vmem:[#allocation8 + $0x7f0] sm:$0xff]  ;;  %v1725_v59 = vld [vmem:[#allocation11 + $0x180] sm:$0xff] }
 0x23d   :  { %2473 = vmatpush1.bf16.msra.mxu0 %v2472_v3  ;;  %2601 = vmatpush1.bf16.msra.mxu1 %v2600_v4  ;;  %v1338_v3 = vld [vmem:[#allocation8 + $0x718] sm:$0xff]  ;;  %v1726_v60 = vld [vmem:[#allocation11 + $0x188] sm:$0xff] }
 0x23e   :  { %2475 = vmatprep.subr.bf16.mxu0 %v2474_v7  ;;  %2603 = vmatprep.subr.bf16.mxu1 %v2602_v8  ;;  %v1342_v4 = vld [vmem:[#allocation8 + $0x738] sm:$0xff]  ;;  %v1335_v7 = vld [vmem:[#allocation8 + $0x700] sm:$0xff]  ;;  %v2670_v2 = vpack.c.bf16 %v1726_v60, %v1725_v59  ;;  %v1718_v59 = vld [vmem:[#allocation11 + $0x148] sm:$0xff] }
 0x23f   :  { %v1339_v8 = vld [vmem:[#allocation8 + $0x720] sm:$0xff]  ;;  %v2622_v10 = vpack.c.bf16 %v1342_v4, %v1338_v3  ;;  %v1710_v4 = vld [vmem:[#allocation11 + $0x108] sm:$0xff]  ;;  %v1703_v60 = vld [vmem:[#allocation11 + $0xd0] sm:$0xff] }
 0x240   :  { %v2496_v17 = vpack.c.bf16 %v1339_v8, %v1335_v7  ;;  %v1709_v3 = vld [vmem:[#allocation11 + $0x100] sm:$0xff]  ;;  %v1727_v7 = vld [vmem:[#allocation11 + $0x190] sm:$0xff]  ;;  %v1728_v8 = vld [vmem:[#allocation11 + $0x198] sm:$0xff] }
 0x241   :  { %2477 = vmatpush1.bf16.msra.mxu0 %v2476_v15  ;;  %2605 = vmatpush1.bf16.msra.mxu1 %v2604_v16  ;;  %v1346_v15 = vld [vmem:[#allocation8 + $0x758] sm:$0xff]  ;;  %v2674_v14 = vpack.c.bf16 %v1728_v8, %v1727_v7  ;;  %v1705_v7 = vld [vmem:[#allocation11 + $0xe0] sm:$0xff]  ;;  %v1706_v8 = vld [vmem:[#allocation11 + $0xe8] sm:$0xff] }
 0x242   :  { %2479 = vmatprep.subr.bf16.mxu0 %v2478_v19  ;;  %2607 = vmatprep.subr.bf16.mxu1 %v2606_v20  ;;  %v1350_v16 = vld [vmem:[#allocation8 + $0x778] sm:$0xff]  ;;  %v1343_v19 = vld [vmem:[#allocation8 + $0x740] sm:$0xff] }
 0x243   :  { %v1347_v20 = vld [vmem:[#allocation8 + $0x760] sm:$0xff]  ;;  %v2626_v22 = vpack.c.bf16 %v1350_v16, %v1346_v15  ;;  %v1711_v15 = vld [vmem:[#allocation11 + $0x110] sm:$0xff] }
 0x244   :  { %v2500_v34 = vpack.c.bf16 %v1347_v20, %v1343_v19  ;;  %v1712_v16 = vld [vmem:[#allocation11 + $0x118] sm:$0xff]  ;;  %v1729_v19 = vld [vmem:[#allocation11 + $0x1a0] sm:$0xff]  ;;  %v1730_v20 = vld [vmem:[#allocation11 + $0x1a8] sm:$0xff] }
 0x245   :  { %2481 = vmatpush1.bf16.msra.mxu0 %v2480_v32  ;;  %2609 = vmatpush1.bf16.msra.mxu1 %v2608_v33  ;;  %v1354_v32 = vld [vmem:[#allocation8 + $0x798] sm:$0xff]  ;;  %v2678_v26 = vpack.c.bf16 %v1730_v20, %v1729_v19 }
 0x246   :  { %2483 = vmatprep.subr.bf16.mxu0 %v2482_v36  ;;  %2611 = vmatprep.subr.bf16.mxu1 %v2610_v37  ;;  %v1358_v33 = vld [vmem:[#allocation8 + $0x7b8] sm:$0xff]  ;;  %v1351_v36 = vld [vmem:[#allocation8 + $0x780] sm:$0xff] }
 0x247   :  { %v1355_v37 = vld [vmem:[#allocation8 + $0x7a0] sm:$0xff]  ;;  %v2630_v41 = vpack.c.bf16 %v1358_v33, %v1354_v32  ;;  %v1714_v33 = vld [vmem:[#allocation11 + $0x128] sm:$0xff]  ;;  %v1707_v20 = vld [vmem:[#allocation11 + $0xf0] sm:$0xff] }
 0x248   :  { %v2504_v48 = vpack.c.bf16 %v1355_v37, %v1351_v36  ;;  %v1713_v32 = vld [vmem:[#allocation11 + $0x120] sm:$0xff]  ;;  %v1731_v36 = vld [vmem:[#allocation11 + $0x1b0] sm:$0xff]  ;;  %v1732_v37 = vld [vmem:[#allocation11 + $0x1b8] sm:$0xff] }
 0x249   :  { %2485 = vmatpush1.bf16.msra.mxu0 %v2484_v45  ;;  %2613 = vmatpush1.bf16.msra.mxu1 %v2612_v46  ;;  %v1364_v45 = vld [vmem:[#allocation8 + $0x7e8] sm:$0xff]  ;;  %v1362_v46 = vld [vmem:[#allocation8 + $0x7d8] sm:$0xff] }
 0x24a   :  { %2487 = vmatprep.subr.bf16.mxu0 %v2486_v49  ;;  %2615 = vmatprep.subr.bf16.mxu1 %v2614_v50  ;;  %v2632_v49 = vpack.c.bf16 %v1357_v43, %v1353_v42  ;;  %v1359_v50 = vld [vmem:[#allocation8 + $0x7c0] sm:$0xff]  ;;  %v2506_v53 = vpack.c.bf16 %v1364_v45, %v1360_v44  ;;  %v2634_v54 = vpack.c.bf16 %v1366_v47, %v1362_v46  ;;  %v1683_v42 = vld [vmem:[#allocation11 + $0x30] sm:$0xff] }
 0x24b   :  { %v1684_v43 = vld [vmem:[#allocation11 + $0x38] sm:$0xff]  ;;  %v2682_v45 = vpack.c.bf16 %v1732_v37, %v1731_v36  ;;  %v1715_v46 = vld [vmem:[#allocation11 + $0x130] sm:$0xff] }
 0x24c   :  { %v1716_v47 = vld [vmem:[#allocation11 + $0x138] sm:$0xff]  ;;  %v2652_v52 = vpack.c.bf16 %v1684_v43, %v1683_v42 }
 0x24d   :  { %2489 = vmatpush1.bf16.msra.mxu0 %v2488_v57  ;;  %2617 = vmatpush1.bf16.msra.mxu1 %v2616_v58  ;;  %v1693_v57 = vld [vmem:[#allocation11 + $0x80] sm:$0xff]  ;;  %v1694_v58 = vld [vmem:[#allocation11 + $0x88] sm:$0xff]  ;;  %v1367_v37 = vld [vmem:[#allocation10] sm:$0xf] }
 0x24e   :  { %2491 = vmatprep.subr.bf16.mxu0 %v2490_v61  ;;  %2619 = vmatprep.subr.bf16.mxu1 %v2618_v62  ;;  %v2508_v61 = vpack.c.bf16 %v1363_v51, %v1359_v50  ;;  %v2636_v62 = vpack.c.bf16 %v1365_v56, %v1361_v55  ;;  %v2638_v29 = vpack.c.bf16 %v1694_v58, %v1693_v57  ;;  %v1733_v50 = vld [vmem:[#allocation11 + $0x1c0] sm:$0xff]  ;;  %v1734_v51 = vld [vmem:[#allocation11 + $0x1c8] sm:$0xff] }
 0x24f   :  { %v1686_v55 = vld [vmem:[#allocation11 + $0x48] sm:$0xff]  ;;  %v2686_v57 = vpack.c.bf16 %v1734_v51, %v1733_v50  ;;  %v1717_v58 = vld [vmem:[#allocation11 + $0x140] sm:$0xff]  ;;  %v1376_v42 = vrot.slane %v1367_v37, %v521_v30  ;;  %v1384_v43 = vrot.slane %v1367_v37, %v529_v31 }
 0x250   :  { %v2688_v1 = vpack.c.bf16 %v1718_v59, %v1717_v58 }
 0x251   :  { %2493 = vmatpush1.bf16.msra.mxu0 %v2492_v5  ;;  %2621 = vmatpush1.bf16.msra.mxu1 %v2620_v6  ;;  %v1695_v5 = vld [vmem:[#allocation11 + $0x90] sm:$0xff]  ;;  %v1696_v6 = vld [vmem:[#allocation11 + $0x98] sm:$0xff] }
 0x252   :  { %2495 = vmatprep.subr.bf16.mxu0 %v2494_v9  ;;  %2623 = vmatprep.subr.bf16.mxu1 %v2622_v10  ;;  %v2640_v9 = vpack.c.bf16 %v1678_v0, %v1677_v63  ;;  %v2672_v10 = vpack.c.bf16 %v1710_v4, %v1709_v3  ;;  %v2642_v38 = vpack.c.bf16 %v1696_v6, %v1695_v5  ;;  %v1736_v63 = vld [vmem:[#allocation11 + $0x1d8] sm:$0xff]  ;;  %v1719_v5 = vld [vmem:[#allocation11 + $0x150] sm:$0xff] }
 0x253   :  { %v1720_v6 = vld [vmem:[#allocation11 + $0x158] sm:$0xff] }
 0x255   :  { %2497 = vmatpush1.bf16.msra.mxu0 %v2496_v17  ;;  %2625 = vmatpush1.bf16.msra.mxu1 %v2624_v18  ;;  %v1697_v17 = vld [vmem:[#allocation11 + $0xa0] sm:$0xff]  ;;  %v1698_v18 = vld [vmem:[#allocation11 + $0xa8] sm:$0xff] }
 0x256   :  { %2499 = vmatprep.subr.bf16.mxu0 %v2498_v21  ;;  %2627 = vmatprep.subr.bf16.mxu1 %v2626_v22  ;;  %v2644_v21 = vpack.c.bf16 %v1680_v12, %v1679_v11  ;;  %v2676_v22 = vpack.c.bf16 %v1712_v16, %v1711_v15  ;;  %v2646_v25 = vpack.c.bf16 %v1698_v18, %v1697_v17  ;;  %v1690_v15 = vld [vmem:[#allocation11 + $0x68] sm:$0xff]  ;;  %v1721_v16 = vld [vmem:[#allocation11 + $0x160] sm:$0xff] }
 0x257   :  { %v2692_v12 = vpack.c.bf16 %v1720_v6, %v1719_v5  ;;  %v1722_v18 = vld [vmem:[#allocation11 + $0x168] sm:$0xff] }
 0x258   :  { %v2696_v19 = vpack.c.bf16 %v1722_v18, %v1721_v16 }
 0x259   :  { %2501 = vmatpush1.bf16.msra.mxu0 %v2500_v34  ;;  %2629 = vmatpush1.bf16.msra.mxu1 %v2628_v35  ;;  %v1699_v34 = vld [vmem:[#allocation11 + $0xb0] sm:$0xff]  ;;  %v1700_v35 = vld [vmem:[#allocation11 + $0xb8] sm:$0xff] }
 0x25a   :  { %2503 = vmatprep.subr.bf16.mxu0 %v2502_v40  ;;  %2631 = vmatprep.subr.bf16.mxu1 %v2630_v41  ;;  %v2648_v40 = vpack.c.bf16 %v1682_v24, %v1681_v23  ;;  %v2680_v41 = vpack.c.bf16 %v1714_v33, %v1713_v32  ;;  %v2650_v44 = vpack.c.bf16 %v1700_v35, %v1699_v34  ;;  %v1740_v24 = vld [vmem:[#allocation11 + $0x1f8] sm:$0xff]  ;;  %v1723_v34 = vld [vmem:[#allocation11 + $0x170] sm:$0xff] }
 0x25b   :  { %v1724_v35 = vld [vmem:[#allocation11 + $0x178] sm:$0xff] }
 0x25c   :  { %v2700_v36 = vpack.c.bf16 %v1724_v35, %v1723_v34 }
 0x25d   :  { %2505 = vmatpush1.bf16.msra.mxu0 %v2504_v48  ;;  %2633 = vmatpush1.bf16.msra.mxu1 %v2632_v49  ;;  %v1701_v48 = vld [vmem:[#allocation11 + $0xc0] sm:$0xff]  ;;  %v1702_v49 = vld [vmem:[#allocation11 + $0xc8] sm:$0xff] }
 0x25e   :  { %2507 = vmatprep.subr.bf16.mxu0 %v2506_v53  ;;  %2635 = vmatprep.subr.bf16.mxu1 %v2634_v54  ;;  %v2684_v53 = vpack.c.bf16 %v1716_v47, %v1715_v46  ;;  %v1685_v54 = vld [vmem:[#allocation11 + $0x40] sm:$0xff]  ;;  %v2654_v56 = vpack.c.bf16 %v1702_v49, %v1701_v48 }
 0x25f   :  { %v2656_v0 = vpack.c.bf16 %v1686_v55, %v1685_v54 }
 0x261   :  { %2509 = vmatpush1.bf16.msra.mxu0 %v2508_v61  ;;  %2637 = vmatpush1.bf16.msra.mxu1 %v2636_v62  ;;  %v1704_v61 = vld [vmem:[#allocation11 + $0xd8] sm:$0xff]  ;;  %v1735_v62 = vld [vmem:[#allocation11 + $0x1d0] sm:$0xff] }
 0x262   :  { %2639 = vmatprep.subr.bf16.mxu0 %v2638_v29  ;;  %2671 = vmatprep.subr.bf16.mxu1 %v2670_v2  ;;  %v1687_v29 = vld [vmem:[#allocation11 + $0x50] sm:$0xff]  ;;  %v1688_v2 = vld [vmem:[#allocation11 + $0x58] sm:$0xff]  ;;  %v2658_v3 = vpack.c.bf16 %v1704_v61, %v1703_v60  ;;  %v2690_v4 = vpack.c.bf16 %v1736_v63, %v1735_v62 }
 0x263   :  { %v2660_v11 = vpack.c.bf16 %v1688_v2, %v1687_v29 }
 0x264   :  { %1525 = vmatmul.mubr.f32.vlgmr.msra.gmra.mrb[2].mxu0 %v1109_v13  ;;  %1667 = vmatmul.mubr.f32.vlgmr.msra.gmra.mrb[2].mxu1 %v1109_v13  ;;  %v2662_v13 = vpack.c.bf16 %v1706_v8, %v1705_v7 }
 0x265   :  { %2641 = vmatpush3.bf16.msra.mxu0 %v2640_v9  ;;  %2673 = vmatpush3.bf16.msra.mxu1 %v2672_v10  ;;  %v1737_v9 = vld [vmem:[#allocation11 + $0x1e0] sm:$0xff]  ;;  %v1738_v10 = vld [vmem:[#allocation11 + $0x1e8] sm:$0xff] }
 0x266   :  { %2643 = vmatprep.subr.bf16.mxu0 %v2642_v38  ;;  %2675 = vmatprep.subr.bf16.mxu1 %v2674_v14  ;;  %v2694_v38 = vpack.c.bf16 %v1738_v10, %v1737_v9  ;;  %v1689_v14 = vld [vmem:[#allocation11 + $0x60] sm:$0xff] }
 0x267   :  { %v2664_v17 = vpack.c.bf16 %v1690_v15, %v1689_v14 }
 0x269   :  { %2645 = vmatpush3.bf16.msra.mxu0 %v2644_v21  ;;  %2677 = vmatpush3.bf16.msra.mxu1 %v2676_v22  ;;  %v1708_v21 = vld [vmem:[#allocation11 + $0xf8] sm:$0xff]  ;;  %v1739_v22 = vld [vmem:[#allocation11 + $0x1f0] sm:$0xff] }
 0x26a   :  { %2647 = vmatprep.subr.bf16.mxu0 %v2646_v25  ;;  %2679 = vmatprep.subr.bf16.mxu1 %v2678_v26  ;;  %v2666_v23 = vpack.c.bf16 %v1708_v21, %v1707_v20  ;;  %v1691_v25 = vld [vmem:[#allocation11 + $0x70] sm:$0xff]  ;;  %v1692_v26 = vld [vmem:[#allocation11 + $0x78] sm:$0xff]  ;;  %v2698_v32 = vpack.c.bf16 %v1740_v24, %v1739_v22 }
 0x26b   :  { %v2668_v33 = vpack.c.bf16 %v1692_v26, %v1691_v25 }
 0x26d   :  { %2649 = vmatpush3.bf16.msra.mxu0 %v2648_v40  ;;  %2681 = vmatpush3.bf16.msra.mxu1 %v2680_v41  ;;  %v1372_v40 = vrot.slane %v1367_v37, %v517_v28  ;;  %v1380_v41 = vrot.slane %v1367_v37, %v525_v39 }
 0x26e   :  { %2651 = vmatprep.subr.bf16.mxu0 %v2650_v44  ;;  %2683 = vmatprep.subr.bf16.mxu1 %v2682_v45 }
 0x271   :  { %2653 = vmatpush3.bf16.msra.mxu0 %v2652_v52  ;;  %2685 = vmatpush3.bf16.msra.mxu1 %v2684_v53 }
 0x272   :  { %2655 = vmatprep.subr.bf16.mxu0 %v2654_v56  ;;  %2687 = vmatprep.subr.bf16.mxu1 %v2686_v57 }
 0x275   :  { %2657 = vmatpush3.bf16.msra.mxu0 %v2656_v0  ;;  %2689 = vmatpush3.bf16.msra.mxu1 %v2688_v1 }
 0x276   :  { %2659 = vmatprep.subr.bf16.mxu0 %v2658_v3  ;;  %2691 = vmatprep.subr.bf16.mxu1 %v2690_v4 }
 0x279   :  { %2661 = vmatpush3.bf16.msra.mxu0 %v2660_v11  ;;  %2693 = vmatpush3.bf16.msra.mxu1 %v2692_v12 }
 0x27a   :  { %2663 = vmatprep.subr.bf16.mxu0 %v2662_v13  ;;  %2695 = vmatprep.subr.bf16.mxu1 %v2694_v38 }
 0x27d   :  { %2665 = vmatpush3.bf16.msra.mxu0 %v2664_v17  ;;  %2697 = vmatpush3.bf16.msra.mxu1 %v2696_v19 }
 0x27e   :  { %2667 = vmatprep.subr.bf16.mxu0 %v2666_v23  ;;  %2699 = vmatprep.subr.bf16.mxu1 %v2698_v32 }
 0x281   :  { %2669 = vmatpush3.bf16.msra.mxu0 %v2668_v33  ;;  %2701 = vmatpush3.bf16.msra.mxu1 %v2700_v36 }
 0x337   :  { %v1526_v44 = vpop.f32.mrb[2].mxu0  ;;  %v1668_v45 = vpop.f32.mrb[2].mxu1 }
 0x338   :  { %v2706_v46 = vadd.f32 %v1526_v44, %v1372_v40  ;;  %v2708_v47 = vadd.f32 %v1668_v45, %v1380_v41  ;;  %v1528_v48 = vpop.f32.mrb[3].mxu0  ;;  %v1670_v49 = vpop.f32.mrb[3].mxu1 }
 0x339   :  { %v2707_v50 = vadd.f32 %v1528_v48, %v1376_v42  ;;  %v2709_v51 = vadd.f32 %v1670_v49, %v1384_v43 }
 0x33a   :  { %v1673_v28 = vmax.f32 %v2706_v46, 0.0  ;;  %v1675_v54 = vmax.f32 %v2708_v47, 0.0 }
 0x33b   :  { %v1674_v52 = vmax.f32 %v2707_v50, 0.0  ;;  %v1676_v53 = vmax.f32 %v2709_v51, 0.0 }
 0x33d   :  { %1812 = vmatprep.mubr.f32.mxu0 %v1674_v52  ;;  %1882 = vmatprep.mubr.f32.mxu1 %v1676_v53 }
 0x33e   :  { %1813 = vmatmul.mubr.f32.vlgmr.msra.gmra.mrb[4].mxu0 %v1673_v28  ;;  %1883 = vmatmul.mubr.f32.vlgmr.msra.gmra.mrb[4].mxu1 %v1675_v54 }
 0x411   :  { %v1952_v30 = vpop.f32.mrb[4].mxu0  ;;  %v1987_v39 = vpop.f32.mrb[4].mxu1 }
 0x412   :  { %v1953_v31 = vpop.f32.mrb[5].mxu0  ;;  %v1988_v55 = vpop.f32.mrb[5].mxu1 }
 0x413   :  { %v1954_v56 = vadd.f32 %v1953_v31, %v1952_v30  ;;  %v1989_v57 = vadd.f32 %v1988_v55, %v1987_v39 }
 0x415   :  { %v1815_v58 = vadd.f32 %v1954_v56, %v1919_v27 }
 0x417   :  { %v1885_v59 = vadd.f32 %v1989_v57, %v1815_v58 }
 0x419   :  { %1888 = vmax.xlane.f32.xlu0 %v1885_v59 }
 0x4a6   :  { %v1889_v60 = vpop.xlane.xlu0 %1888 }
 0x4a7   :  { %v1890_v61 = vsub.f32 %v1885_v59, %v1889_v60 }
 0x4a9   :  { %v1891_v62 = vmul.f32 1.442695, %v1890_v61 }
 0x4ab   :  { %2739 = vpow2.f32 %v1891_v62 }
 0x4b5   :  { %v2740_v63 = vpop.eup %2739 }
 0x4b6   :  { %1893 = vadd.xlane.f32.xlu0 %v2740_v63 }
 0x543   :  { %v1894_v0 = vpop.xlane.xlu0 %1893 }
 0x544   :  { %2741 = vlog2.f32 %v1894_v0 }
 0x54e   :  { %v2742_v1 = vpop.eup %2741 }
 0x54f   :  { %v1896_v29 = vmul.f32 0.6931472, %v2742_v1 }
 0x551   :  { %v1897_v2 = vsub.f32 %v1890_v61, %v1896_v29 }
 0x553   :  { %1898 = vst [vmem:[#allocation14] sm:$0xff] %v1897_v2 }
 0x554   :  { %2908 = shalt.err (!%p2905_p4)
}
 0x555   :  { %s2909_s11 = scalar_lea.hbm %s3116_s7, 128 }
 0x556   :  { %p2910_p5 = scmp.ne.s32.totalorder %s3116_s7, %s2909_s11  ;;  %p2913_p6 = scmp.lt.u32.totalorder %s2909_s11, %s3116_s7 }
 0x558   :  { %p2915_p7 = pnand %p2913_p6, %p2910_p5 }
 0x55a   :  { %2918 = shalt.err (!%p2915_p7)
}
 0x55b   :  { %1908 = dma.vmem_to_hbm [thread:$0]  %s1906_s13, 128, %s3116_s7, [#allocation4]  }
 0x55c   :  { %2927 = dma.done.wait [#allocation4], 128  }
 0x55d   :  { %2928 = vsyncadd [#allocation4], 4294967168 }
 0x55e   :  { %1912 = vsyncpa [#allocation3], 1 }
 0x55f   :  { %1913 = vsyncpa [#allocation6], 1 }
 0x560   :  { %1914 = vsyncpa [#allocation9], 1 }
 0x561   :  { %1915 = vsyncpa [#allocation12], 1 }
 0x562   :  { %1916 = vsyncpa [#allocation4], 1 }

</bundles_post_ra>
